<compile_context>
chip_gen: v7x
topology: tpu7x:2x2x1
jax: 0.10.0
libtpu: 0.0.40
codegen_flags: <defaults>
</compile_context>

<pallas_src>
import functools

import jax
import jax.numpy as jnp
from jax.experimental import pallas as pl
from jax.experimental.pallas import tpu as pltpu

D_IN = 28 * 28          # 784
D_IN_PAD = 7 * 128      # 896  (zero-padded K for layer 1)
D_H = 512
D_OUT = 10
D_OUT_PAD = 128         # lane-dense output width


def _round_up(n, m):
    return ((n + m - 1) // m) * m


def mlp_kernel(x_ref, w1_ref, b1_ref, w2_ref, b2_ref, w3_ref, b3_ref,
               w4_ref, b4_ref, o_ref, *, compute_dtype):
    # Layer 1: [tb, 896] @ [896, 512] (bf16 -> f32 acc), +bias, ReLU
    h = jnp.dot(x_ref[...], w1_ref[...], preferred_element_type=jnp.float32)
    h = jnp.maximum(h + b1_ref[...], 0.0).astype(compute_dtype)
    # Layer 2: [tb, 512] @ [512, 512]
    h = jnp.dot(h, w2_ref[...], preferred_element_type=jnp.float32)
    h = jnp.maximum(h + b2_ref[...], 0.0).astype(compute_dtype)
    # Layer 3: [tb, 512] @ [512, 512]
    h = jnp.dot(h, w3_ref[...], preferred_element_type=jnp.float32)
    h = jnp.maximum(h + b3_ref[...], 0.0).astype(compute_dtype)
    # Output: [tb, 512] @ [512, 128]  (cols 10..127 of w4/b4 are zero padding)
    logits = jnp.dot(h, w4_ref[...], preferred_element_type=jnp.float32)
    o_ref[...] = (logits + b4_ref[...]).astype(o_ref.dtype)


def prepare_params(params, compute_dtype=jnp.bfloat16):
    """Cast weights to the MXU compute dtype and apply layout padding."""
    (w1, b1), (w2, b2), (w3, b3), (w4, b4) = params
    w1p = jnp.pad(w1, ((0, D_IN_PAD - D_IN), (0, 0))).astype(compute_dtype)
    w2p = w2.astype(compute_dtype)
    w3p = w3.astype(compute_dtype)
    w4p = jnp.pad(w4, ((0, 0), (0, D_OUT_PAD - D_OUT))).astype(compute_dtype)
    b4p = jnp.pad(b4, ((0, 0), (0, D_OUT_PAD - D_OUT))).astype(jnp.float32)
    return (w1p, b1.astype(jnp.float32),
            w2p, b2.astype(jnp.float32),
            w3p, b3.astype(jnp.float32),
            w4p, b4p)


@functools.partial(jax.jit, static_argnames=("tb", "compute_dtype"))
def mlp_forward(x_nchw, prepared, *, tb=256, compute_dtype=jnp.bfloat16):
    """x_nchw: [B, 1, 28, 28] float32. Returns logits [B, 10] float32."""
    b = x_nchw.shape[0]
    x = x_nchw.reshape(b, -1).astype(compute_dtype)           # nn.Flatten
    x = jnp.pad(x, ((0, 0), (0, D_IN_PAD - D_IN)))            # 784 -> 896

    # Clamp the batch tile for tiny batches; round everything to 8 sublanes.
    tb_eff = max(8, _round_up(min(tb, _round_up(b, 8)), 8))
    b_pad = _round_up(b, tb_eff)
    if b_pad != b:
        x = jnp.pad(x, ((0, b_pad - b), (0, 0)))

    w1, b1, w2, b2, w3, b3, w4, b4 = prepared
    grid = (b_pad // tb_eff,)

    def batch_spec(cols):
        return pl.BlockSpec((tb_eff, cols), lambda i: (i, 0))

    def resident_spec(shape):
        # Constant index_map: the block is DMA'd once and stays resident.
        return pl.BlockSpec(shape, lambda i: (0, 0))

    out_pad = pl.pallas_call(
        functools.partial(mlp_kernel, compute_dtype=compute_dtype),
        out_shape=jax.ShapeDtypeStruct((b_pad, D_OUT_PAD), jnp.float32),
        grid_spec=pltpu.PrefetchScalarGridSpec(
            num_scalar_prefetch=0,
            grid=grid,
            in_specs=[
                batch_spec(D_IN_PAD),             # x tile [tb, 896]
                resident_spec((D_IN_PAD, D_H)),   # w1
                resident_spec((1, D_H)),          # b1
                resident_spec((D_H, D_H)),        # w2
                resident_spec((1, D_H)),          # b2
                resident_spec((D_H, D_H)),        # w3
                resident_spec((1, D_H)),          # b3
                resident_spec((D_H, D_OUT_PAD)),  # w4 (padded to 128 cols)
                resident_spec((1, D_OUT_PAD)),    # b4 (padded to 128 cols)
            ],
            out_specs=batch_spec(D_OUT_PAD),      # lane-dense [tb, 128]
        ),
        compiler_params=pltpu.CompilerParams(
            dimension_semantics=("parallel",),
            vmem_limit_bytes=32 * 1024 * 1024,
        ),
    )(x, w1, b1, w2, b2, w3, b3, w4, b4)

    return out_pad[:b, :D_OUT]


def init_params(key):
    """torch.nn.Linear-style init (uniform +/- 1/sqrt(fan_in)).

    Weights are stored as [in, out] (transpose of PyTorch layout) so the
    kernel computes x @ W + b directly. Biases are [1, out].
    """
    dims = [(D_IN, D_H), (D_H, D_H), (D_H, D_H), (D_H, D_OUT)]
    params = []
    for fan_in, fan_out in dims:
        key, kw, kb = jax.random.split(key, 3)
        bound = 1.0 / (fan_in ** 0.5)
        w = jax.random.uniform(kw, (fan_in, fan_out), jnp.float32,
                               minval=-bound, maxval=bound)
        bias = jax.random.uniform(kb, (1, fan_out), jnp.float32,
                                  minval=-bound, maxval=bound)
        params.append((w, bias))
    return params


def reference_forward(x_nchw, params, compute_dtype=jnp.float32):
    """Plain-JAX reference. compute_dtype=bf16 mirrors the kernel's casts."""
    x = x_nchw.reshape(x_nchw.shape[0], -1).astype(compute_dtype)
    (w1, b1), (w2, b2), (w3, b3), (w4, b4) = params

    def layer(h, w, bias, relu=True):
        y = jnp.dot(h, w.astype(compute_dtype),
                    preferred_element_type=jnp.float32) + bias
        if relu:
            y = jnp.maximum(y, 0.0).astype(compute_dtype)
        return y

    h = layer(x, w1, b1)
    h = layer(h, w2, b2)
    h = layer(h, w3, b3)
    return layer(h, w4, b4, relu=False)


if __name__ == "__main__":
    key = jax.random.PRNGKey(0)
    key, kx = jax.random.split(key)
    # MNIST-like input at a small batch: [B, 1, 28, 28]
    x = jax.random.normal(kx, (8, 1, 28, 28), jnp.float32)
    params = init_params(key)
    prepared = prepare_params(params)

    out = mlp_forward(x, prepared)
    out = jax.block_until_ready(out)
    assert out.shape == (8, 10)

    # Match the kernel's bf16 compute path -> tight tolerance.
    ref_bf16 = reference_forward(x, params, compute_dtype=jnp.bfloat16)
    assert jnp.allclose(out, ref_bf16, atol=3e-2, rtol=3e-2), (
        "bf16-matched ref mismatch, max abs diff = "
        f"{float(jnp.max(jnp.abs(out - ref_bf16)))}")

    # Sanity check vs. full-precision (PyTorch-equivalent) reference.
    ref_f32 = reference_forward(x, params, compute_dtype=jnp.float32)
    assert jnp.allclose(out, ref_f32, atol=5e-2, rtol=5e-2), (
        "f32 ref mismatch, max abs diff = "
        f"{float(jnp.max(jnp.abs(out - ref_f32)))}")

    print("KERNEL_OK")
</pallas_src>

<mosaic_0001>
module attributes {stable_mosaic.version = 11 : i64} {
  func.func @mlp_kernel(%arg0: i32, %arg1: memref<8x896xbf16, #tpu.memory_space<vmem>>, %arg2: memref<896x512xbf16, #tpu.memory_space<vmem>>, %arg3: memref<1x512xf32, #tpu.memory_space<vmem>>, %arg4: memref<512x512xbf16, #tpu.memory_space<vmem>>, %arg5: memref<1x512xf32, #tpu.memory_space<vmem>>, %arg6: memref<512x512xbf16, #tpu.memory_space<vmem>>, %arg7: memref<1x512xf32, #tpu.memory_space<vmem>>, %arg8: memref<512x128xbf16, #tpu.memory_space<vmem>>, %arg9: memref<1x128xf32, #tpu.memory_space<vmem>>, %arg10: memref<8x128xf32, #tpu.memory_space<vmem>>) attributes {dimension_semantics = [#tpu.dimension_semantics<parallel>], iteration_bounds = array<i64: 1>, scalar_prefetch = 0 : i64, scratch_operands = 0 : i64, tpu.core_type = #tpu.core_type<tc>, window_params = [{transform_indices = @transform_0, window_bounds = array<i64: 8, 896>}, {pipeline_mode = #tpu.pipeline_mode<synchronous>, transform_indices = @transform_1, window_bounds = array<i64: 896, 512>}, {pipeline_mode = #tpu.pipeline_mode<synchronous>, transform_indices = @transform_2, window_bounds = array<i64: 1, 512>}, {pipeline_mode = #tpu.pipeline_mode<synchronous>, transform_indices = @transform_3, window_bounds = array<i64: 512, 512>}, {pipeline_mode = #tpu.pipeline_mode<synchronous>, transform_indices = @transform_4, window_bounds = array<i64: 1, 512>}, {pipeline_mode = #tpu.pipeline_mode<synchronous>, transform_indices = @transform_5, window_bounds = array<i64: 512, 512>}, {pipeline_mode = #tpu.pipeline_mode<synchronous>, transform_indices = @transform_6, window_bounds = array<i64: 1, 512>}, {pipeline_mode = #tpu.pipeline_mode<synchronous>, transform_indices = @transform_7, window_bounds = array<i64: 512, 128>}, {pipeline_mode = #tpu.pipeline_mode<synchronous>, transform_indices = @transform_8, window_bounds = array<i64: 1, 128>}, {transform_indices = @transform_9, window_bounds = array<i64: 8, 128>}]} {
    %c0 = arith.constant 0 : index
    %c0_0 = arith.constant 0 : index
    %0 = vector.load %arg1[%c0, %c0_0] : memref<8x896xbf16, #tpu.memory_space<vmem>>, vector<8x896xbf16>
    %c0_1 = arith.constant 0 : index
    %c0_2 = arith.constant 0 : index
    %1 = vector.load %arg2[%c0_1, %c0_2] : memref<896x512xbf16, #tpu.memory_space<vmem>>, vector<896x512xbf16>
    %cst = arith.constant dense<0.000000e+00> : vector<8x512xf32>
    %2 = tpu.matmul %0, %1, %cst {dimension_numbers = #tpu.dot_dimension_numbers<[1], [0], [0], [1], [0, 0, 1, 1], [], []>} : vector<8x896xbf16>, vector<896x512xbf16>, vector<8x512xf32> -> vector<8x512xf32>
    %c0_3 = arith.constant 0 : index
    %c0_4 = arith.constant 0 : index
    %3 = vector.load %arg3[%c0_3, %c0_4] : memref<1x512xf32, #tpu.memory_space<vmem>>, vector<1x512xf32>
    %4 = vector.broadcast %3 : vector<1x512xf32> to vector<8x512xf32>
    %5 = arith.addf %2, %4 : vector<8x512xf32>
    %cst_5 = arith.constant 0.000000e+00 : f32
    %6 = vector.broadcast %cst_5 : f32 to vector<8x512xf32>
    %7 = arith.maximumf %5, %6 : vector<8x512xf32>
    %8 = arith.truncf %7 : vector<8x512xf32> to vector<8x512xbf16>
    %c0_6 = arith.constant 0 : index
    %c0_7 = arith.constant 0 : index
    %9 = vector.load %arg4[%c0_6, %c0_7] : memref<512x512xbf16, #tpu.memory_space<vmem>>, vector<512x512xbf16>
    %cst_8 = arith.constant dense<0.000000e+00> : vector<8x512xf32>
    %10 = tpu.matmul %8, %9, %cst_8 {dimension_numbers = #tpu.dot_dimension_numbers<[1], [0], [0], [1], [0, 0, 1, 1], [], []>} : vector<8x512xbf16>, vector<512x512xbf16>, vector<8x512xf32> -> vector<8x512xf32>
    %c0_9 = arith.constant 0 : index
    %c0_10 = arith.constant 0 : index
    %11 = vector.load %arg5[%c0_9, %c0_10] : memref<1x512xf32, #tpu.memory_space<vmem>>, vector<1x512xf32>
    %12 = vector.broadcast %11 : vector<1x512xf32> to vector<8x512xf32>
    %13 = arith.addf %10, %12 : vector<8x512xf32>
    %cst_11 = arith.constant 0.000000e+00 : f32
    %14 = vector.broadcast %cst_11 : f32 to vector<8x512xf32>
    %15 = arith.maximumf %13, %14 : vector<8x512xf32>
    %16 = arith.truncf %15 : vector<8x512xf32> to vector<8x512xbf16>
    %c0_12 = arith.constant 0 : index
    %c0_13 = arith.constant 0 : index
    %17 = vector.load %arg6[%c0_12, %c0_13] : memref<512x512xbf16, #tpu.memory_space<vmem>>, vector<512x512xbf16>
    %cst_14 = arith.constant dense<0.000000e+00> : vector<8x512xf32>
    %18 = tpu.matmul %16, %17, %cst_14 {dimension_numbers = #tpu.dot_dimension_numbers<[1], [0], [0], [1], [0, 0, 1, 1], [], []>} : vector<8x512xbf16>, vector<512x512xbf16>, vector<8x512xf32> -> vector<8x512xf32>
    %c0_15 = arith.constant 0 : index
    %c0_16 = arith.constant 0 : index
    %19 = vector.load %arg7[%c0_15, %c0_16] : memref<1x512xf32, #tpu.memory_space<vmem>>, vector<1x512xf32>
    %20 = vector.broadcast %19 : vector<1x512xf32> to vector<8x512xf32>
    %21 = arith.addf %18, %20 : vector<8x512xf32>
    %cst_17 = arith.constant 0.000000e+00 : f32
    %22 = vector.broadcast %cst_17 : f32 to vector<8x512xf32>
    %23 = arith.maximumf %21, %22 : vector<8x512xf32>
    %24 = arith.truncf %23 : vector<8x512xf32> to vector<8x512xbf16>
    %c0_18 = arith.constant 0 : index
    %c0_19 = arith.constant 0 : index
    %25 = vector.load %arg8[%c0_18, %c0_19] : memref<512x128xbf16, #tpu.memory_space<vmem>>, vector<512x128xbf16>
    %cst_20 = arith.constant dense<0.000000e+00> : vector<8x128xf32>
    %26 = tpu.matmul %24, %25, %cst_20 {dimension_numbers = #tpu.dot_dimension_numbers<[1], [0], [0], [1], [0, 0, 1, 1], [], []>} : vector<8x512xbf16>, vector<512x128xbf16>, vector<8x128xf32> -> vector<8x128xf32>
    %c0_21 = arith.constant 0 : index
    %c0_22 = arith.constant 0 : index
    %27 = vector.load %arg9[%c0_21, %c0_22] : memref<1x128xf32, #tpu.memory_space<vmem>>, vector<1x128xf32>
    %28 = vector.broadcast %27 : vector<1x128xf32> to vector<8x128xf32>
    %29 = arith.addf %26, %28 : vector<8x128xf32>
    %c0_23 = arith.constant 0 : index
    %c0_24 = arith.constant 0 : index
    %30 = vector.load %arg10[%c0_23, %c0_24] : memref<8x128xf32, #tpu.memory_space<vmem>>, vector<8x128xf32>
    tpu.vector_store %arg10[%c0_23, %c0_24], %29 {strides = array<i32>} : memref<8x128xf32, #tpu.memory_space<vmem>>, vector<8x128xf32>,
    return
  }
  func.func @transform_0(%arg0: i32) -> (i32, i32) {
    %c0_i32 = arith.constant 0 : i32
    %c0_i32_0 = arith.constant 0 : i32
    return %arg0, %c0_i32 : i32, i32
  }
  func.func @transform_1(%arg0: i32) -> (i32, i32) {
    %c0_i32 = arith.constant 0 : i32
    %c0_i32_0 = arith.constant 0 : i32
    %c0_i32_1 = arith.constant 0 : i32
    return %c0_i32, %c0_i32_0 : i32, i32
  }
  func.func @transform_2(%arg0: i32) -> (i32, i32) {
    %c0_i32 = arith.constant 0 : i32
    %c0_i32_0 = arith.constant 0 : i32
    %c0_i32_1 = arith.constant 0 : i32
    return %c0_i32, %c0_i32_0 : i32, i32
  }
  func.func @transform_3(%arg0: i32) -> (i32, i32) {
    %c0_i32 = arith.constant 0 : i32
    %c0_i32_0 = arith.constant 0 : i32
    %c0_i32_1 = arith.constant 0 : i32
    return %c0_i32, %c0_i32_0 : i32, i32
  }
  func.func @transform_4(%arg0: i32) -> (i32, i32) {
    %c0_i32 = arith.constant 0 : i32
    %c0_i32_0 = arith.constant 0 : i32
    %c0_i32_1 = arith.constant 0 : i32
    return %c0_i32, %c0_i32_0 : i32, i32
  }
  func.func @transform_5(%arg0: i32) -> (i32, i32) {
    %c0_i32 = arith.constant 0 : i32
    %c0_i32_0 = arith.constant 0 : i32
    %c0_i32_1 = arith.constant 0 : i32
    return %c0_i32, %c0_i32_0 : i32, i32
  }
  func.func @transform_6(%arg0: i32) -> (i32, i32) {
    %c0_i32 = arith.constant 0 : i32
    %c0_i32_0 = arith.constant 0 : i32
    %c0_i32_1 = arith.constant 0 : i32
    return %c0_i32, %c0_i32_0 : i32, i32
  }
  func.func @transform_7(%arg0: i32) -> (i32, i32) {
    %c0_i32 = arith.constant 0 : i32
    %c0_i32_0 = arith.constant 0 : i32
    %c0_i32_1 = arith.constant 0 : i32
    return %c0_i32, %c0_i32_0 : i32, i32
  }
  func.func @transform_8(%arg0: i32) -> (i32, i32) {
    %c0_i32 = arith.constant 0 : i32
    %c0_i32_0 = arith.constant 0 : i32
    %c0_i32_1 = arith.constant 0 : i32
    return %c0_i32, %c0_i32_0 : i32, i32
  }
  func.func @transform_9(%arg0: i32) -> (i32, i32) {
    %c0_i32 = arith.constant 0 : i32
    %c0_i32_0 = arith.constant 0 : i32
    return %arg0, %c0_i32 : i32, i32
  }
}

</mosaic_0001>

<bundles_post_ra>
// kernel: mlp_forward.1
= control target key start
LH: loop header
LB: loop body
LE: loop exit
PB: predicated region body
PF: predicated region fallthrough
CT: control target
= control target key end

     0   :  { %14 = vsyncpa [#allocation3], 0  ;;  %s5863_s0 = inlined_call_operand.vmem [shape: bf16[8,896], index: 0, kind: input, shape index: {}]   ;;  %s5864_s1 = inlined_call_operand.hbm [shape: bf16[896,512], index: 1, kind: input, shape index: {}]   ;;  %s5865_s2 = inlined_call_operand.vmem [shape: f32[1,512], index: 2, kind: input, shape index: {}]   ;;  %s5866_s3 = inlined_call_operand.hbm [shape: bf16[512,512], index: 3, kind: input, shape index: {}]   ;;  %s5867_s4 = inlined_call_operand.vmem [shape: f32[1,512], index: 4, kind: input, shape index: {}]   ;;  %s5868_s5 = inlined_call_operand.hbm [shape: bf16[512,512], index: 5, kind: input, shape index: {}]   ;;  %s5869_s6 = inlined_call_operand.vmem [shape: f32[1,512], index: 6, kind: input, shape index: {}]   ;;  %s5870_s7 = inlined_call_operand.vmem [shape: bf16[512,128], index: 7, kind: input, shape index: {}]   ;;  %s5871_s8 = inlined_call_operand.vmem [shape: f32[1,128], index: 8, kind: input, shape index: {}]   ;;  %s5872_s9 = inlined_call_operand.hbm [shape: f32[8,128], index: 9, kind: output, shape index: {}]  }
   0x1   :  { %15 = vsyncpa [#allocation6], 0 }
   0x2   :  { %16 = vsyncpa [#allocation4], 0  ;;  %s5566_s30 = smov [#allocation5]   ;;  %s5567_s11 = smov [#allocation2]  }
   0x3   :  { %s38_s10 = sshll.u32 %s5566_s30, 4  ;;  %s24_s12 = sshll.u32 %s5567_s11, 4  ;;  %s39_s10 = int_to_ptr.vmem [resolvable:$true] %s38_s10  ;;  %s5623_s12 = int_to_ptr.vmem [resolvable:$true] %s24_s12 }
   0x4   :  { %s5472_s15 = scalar_lea.hbm %s5866_s3, 16384 }
   0x5   :  { %p5473_p0 = scmp.ne.s32.totalorder %s5866_s3, %s5472_s15  ;;  %p5476_p1 = scmp.lt.u32.totalorder %s5472_s15, %s5866_s3 }
   0x7   :  { %p5478_p2 = pnand %p5476_p1, %p5473_p0 }
   0x9   :  { %5481 = shalt.err (!%p5478_p2)
}
   0xa   :  { %s5482_s20 = scalar_lea.vmem %s39_s10, 16384  ;;  %p5487_p4 = scmp.lt.s32.totalorder %s39_s10, %s39_s10 }
   0xb   :  { %p5483_p3 = scmp.ne.s32.totalorder %s39_s10, %s5482_s20  ;;  %p5488_p5 = scmp.lt.s32.totalorder %s5482_s20, %s5482_s20 }
   0xd   :  { %p5489_p6 = por %p5488_p5, %p5487_p4 }
   0xf   :  { %p5490_p7 = pnand %p5489_p6, %p5483_p3 }
  0x11   :  { %5493 = shalt.err (!%p5490_p7)
}
  0x12   :  { %s5568_s21 = smov 256   ;;  %s5569_s22 = smov 16  }
  0x13   :  { %44 = dma.hbm_to_vmem [thread:$0]  %s5866_s3, 16384, %s39_s10, [#allocation6], %s5568_s21, %s5568_s21, %s5569_s22  }
  0x14   :  { %s5494_s27 = scalar_lea.hbm %s5864_s1, 28672 }
  0x15   :  { %p5495_p8 = scmp.ne.s32.totalorder %s5864_s1, %s5494_s27  ;;  %p5498_p9 = scmp.lt.u32.totalorder %s5494_s27, %s5864_s1 }
  0x17   :  { %p5500_p10 = pnand %p5498_p9, %p5495_p8 }
  0x19   :  { %5503 = shalt.err (!%p5500_p10)
}
  0x1a   :  { %s5504_s13 = scalar_lea.vmem %s5623_s12, 28672  ;;  %p5509_p12 = scmp.lt.s32.totalorder %s5623_s12, %s5623_s12 }
  0x1b   :  { %p5505_p11 = scmp.ne.s32.totalorder %s5623_s12, %s5504_s13  ;;  %p5510_p13 = scmp.lt.s32.totalorder %s5504_s13, %s5504_s13 }
  0x1d   :  { %p5511_p0 = por %p5510_p13, %p5509_p12 }
  0x1f   :  { %p5512_p1 = pnand %p5511_p0, %p5505_p11 }
  0x21   :  { %5515 = shalt.err (!%p5512_p1)
}
  0x22   :  { %30 = dma.hbm_to_vmem [thread:$0]  %s5864_s1, 28672, %s5623_s12, [#allocation3], %s5568_s21, %s5568_s21, %s5569_s22  }
  0x23   :  { %s5570_s14 = smov [#allocation7]   ;;  %s5516_s18 = scalar_lea.hbm %s5868_s5, 16384 }
  0x24   :  { %s52_s15 = sshll.u32 %s5570_s14, 4  ;;  %p5517_p2 = scmp.ne.s32.totalorder %s5868_s5, %s5516_s18  ;;  %s53_s15 = int_to_ptr.vmem [resolvable:$true] %s52_s15 }
  0x25   :  { %p5520_p3 = scmp.lt.u32.totalorder %s5516_s18, %s5868_s5 }
  0x27   :  { %p5522_p4 = pnand %p5520_p3, %p5517_p2 }
  0x29   :  { %5525 = shalt.err (!%p5522_p4)
}
  0x2a   :  { %s5526_s25 = scalar_lea.vmem %s53_s15, 16384  ;;  %p5531_p6 = scmp.lt.s32.totalorder %s53_s15, %s53_s15 }
  0x2b   :  { %p5527_p5 = scmp.ne.s32.totalorder %s53_s15, %s5526_s25  ;;  %p5532_p7 = scmp.lt.s32.totalorder %s5526_s25, %s5526_s25 }
  0x2d   :  { %p5533_p8 = por %p5532_p7, %p5531_p6 }
  0x2f   :  { %p5534_p9 = pnand %p5533_p8, %p5527_p5 }
  0x31   :  { %5537 = shalt.err (!%p5534_p9)
}
  0x32   :  { %58 = dma.hbm_to_vmem [thread:$0]  %s5868_s5, 16384, %s53_s15, [#allocation6], %s5568_s21, %s5568_s21, %s5569_s22  }
  0x33   :  { %5560 = dma.done.wait [#allocation3], 28672  }
  0x34   :  { %5561 = vsyncadd [#allocation3], 4294938624 }
  0x35   :  { %5562 = dma.done.wait [#allocation6], 32768  }
  0x36   :  { %5563 = vsyncadd [#allocation6], 4294934528  ;;  %v4713_v0 = vld [vmem:[#allocation2 + $0x4] ss:$16 sps:$4 sm:$0xff]   ;;  %v4715_v1 = vld [vmem:[#allocation2 + $0xc] ss:$16 sps:$4 sm:$0xff]  }
  0x37   :  { %1470 = vmatprep.subr.bf16.mxu0 %v4713_v0  ;;  %v4717_v2 = vld [vmem:[#allocation2] ss:$16 sps:$4 sm:$0xff]   ;;  %v4718_v3 = vld [vmem:[#allocation2 + $0x8] ss:$16 sps:$4 sm:$0xff]   ;;  %1634 = vmatprep.subr.bf16.mxu1 %v4715_v1  ;;  %v4719_v4 = vld [vmem:[#allocation2 + $0x24] ss:$16 sps:$4 sm:$0xff]  }
  0x38   :  { %1471 = vmatpush1.bf16.msra.mxu0 %v4717_v2  ;;  %1635 = vmatpush1.bf16.msra.mxu1 %v4718_v3  ;;  %v4721_v5 = vld [vmem:[#allocation2 + $0x2c] ss:$16 sps:$4 sm:$0xff]   ;;  %v4723_v6 = vld [vmem:[#allocation2 + $0x20] ss:$16 sps:$4 sm:$0xff]   ;;  %v4724_v7 = vld [vmem:[#allocation2 + $0x28] ss:$16 sps:$4 sm:$0xff]  }
  0x39   :  { %1472 = vmatprep.subr.bf16.mxu0 %v4719_v4  ;;  %1636 = vmatprep.subr.bf16.mxu1 %v4721_v5  ;;  %v4725_v8 = vld [vmem:[#allocation2 + $0x44] ss:$16 sps:$4 sm:$0xff]   ;;  %v4727_v9 = vld [vmem:[#allocation2 + $0x4c] ss:$16 sps:$4 sm:$0xff]   ;;  %v4729_v10 = vld [vmem:[#allocation2 + $0x40] ss:$16 sps:$4 sm:$0xff]  }
  0x3a   :  { %v4730_v11 = vld [vmem:[#allocation2 + $0x48] ss:$16 sps:$4 sm:$0xff]   ;;  %v4731_v12 = vld [vmem:[#allocation2 + $0x64] ss:$16 sps:$4 sm:$0xff]   ;;  %v4733_v13 = vld [vmem:[#allocation2 + $0x6c] ss:$16 sps:$4 sm:$0xff]  }
  0x3b   :  { %v4735_v14 = vld [vmem:[#allocation2 + $0x60] ss:$16 sps:$4 sm:$0xff]   ;;  %v4736_v15 = vld [vmem:[#allocation2 + $0x68] ss:$16 sps:$4 sm:$0xff]   ;;  %v4737_v16 = vld [vmem:[#allocation2 + $0x84] ss:$16 sps:$4 sm:$0xff]  }
  0x3c   :  { %1473 = vmatpush1.bf16.msra.mxu0 %v4723_v6  ;;  %1637 = vmatpush1.bf16.msra.mxu1 %v4724_v7  ;;  %v4739_v17 = vld [vmem:[#allocation2 + $0x8c] ss:$16 sps:$4 sm:$0xff]   ;;  %v4741_v18 = vld [vmem:[#allocation2 + $0x80] ss:$16 sps:$4 sm:$0xff]   ;;  %v4742_v19 = vld [vmem:[#allocation2 + $0x88] ss:$16 sps:$4 sm:$0xff]  }
  0x3d   :  { %1474 = vmatprep.subr.bf16.mxu0 %v4725_v8  ;;  %1638 = vmatprep.subr.bf16.mxu1 %v4727_v9  ;;  %v4743_v20 = vld [vmem:[#allocation2 + $0xa4] ss:$16 sps:$4 sm:$0xff]   ;;  %v4745_v21 = vld [vmem:[#allocation2 + $0xac] ss:$16 sps:$4 sm:$0xff]   ;;  %v4747_v22 = vld [vmem:[#allocation2 + $0xa0] ss:$16 sps:$4 sm:$0xff]  }
  0x3e   :  { %v4748_v23 = vld [vmem:[#allocation2 + $0xa8] ss:$16 sps:$4 sm:$0xff]   ;;  %v4749_v24 = vld [vmem:[#allocation2 + $0xc4] ss:$16 sps:$4 sm:$0xff]   ;;  %v4751_v25 = vld [vmem:[#allocation2 + $0xcc] ss:$16 sps:$4 sm:$0xff]  }
  0x3f   :  { %v4753_v26 = vld [vmem:[#allocation2 + $0xc0] ss:$16 sps:$4 sm:$0xff]   ;;  %v4754_v27 = vld [vmem:[#allocation2 + $0xc8] ss:$16 sps:$4 sm:$0xff]   ;;  %v4755_v28 = vld [vmem:[#allocation2 + $0xe4] ss:$16 sps:$4 sm:$0xff]  }
  0x40   :  { %1475 = vmatpush1.bf16.msra.mxu0 %v4729_v10  ;;  %1639 = vmatpush1.bf16.msra.mxu1 %v4730_v11  ;;  %v4757_v29 = vld [vmem:[#allocation2 + $0xec] ss:$16 sps:$4 sm:$0xff]   ;;  %v4759_v30 = vld [vmem:[#allocation2 + $0xe0] ss:$16 sps:$4 sm:$0xff]   ;;  %v4760_v31 = vld [vmem:[#allocation2 + $0xe8] ss:$16 sps:$4 sm:$0xff]  }
  0x41   :  { %1476 = vmatprep.subr.bf16.mxu0 %v4731_v12  ;;  %1640 = vmatprep.subr.bf16.mxu1 %v4733_v13  ;;  %v4761_v32 = vld [vmem:[#allocation2 + $0x104] ss:$16 sps:$4 sm:$0xff]   ;;  %v4763_v33 = vld [vmem:[#allocation2 + $0x10c] ss:$16 sps:$4 sm:$0xff]   ;;  %v4765_v34 = vld [vmem:[#allocation2 + $0x100] ss:$16 sps:$4 sm:$0xff]  }
  0x42   :  { %v4766_v35 = vld [vmem:[#allocation2 + $0x108] ss:$16 sps:$4 sm:$0xff]   ;;  %v4767_v36 = vld [vmem:[#allocation2 + $0x124] ss:$16 sps:$4 sm:$0xff]   ;;  %v4769_v37 = vld [vmem:[#allocation2 + $0x12c] ss:$16 sps:$4 sm:$0xff]  }
  0x43   :  { %v4771_v38 = vld [vmem:[#allocation2 + $0x120] ss:$16 sps:$4 sm:$0xff]   ;;  %v4772_v39 = vld [vmem:[#allocation2 + $0x128] ss:$16 sps:$4 sm:$0xff]   ;;  %v4773_v40 = vld [vmem:[#allocation2 + $0x144] ss:$16 sps:$4 sm:$0xff]  }
  0x44   :  { %1477 = vmatpush1.bf16.msra.mxu0 %v4735_v14  ;;  %1641 = vmatpush1.bf16.msra.mxu1 %v4736_v15  ;;  %v4775_v41 = vld [vmem:[#allocation2 + $0x14c] ss:$16 sps:$4 sm:$0xff]   ;;  %v4777_v42 = vld [vmem:[#allocation2 + $0x140] ss:$16 sps:$4 sm:$0xff]   ;;  %v4778_v43 = vld [vmem:[#allocation2 + $0x148] ss:$16 sps:$4 sm:$0xff]  }
  0x45   :  { %1478 = vmatprep.subr.bf16.mxu0 %v4737_v16  ;;  %1642 = vmatprep.subr.bf16.mxu1 %v4739_v17  ;;  %v4779_v44 = vld [vmem:[#allocation2 + $0x164] ss:$16 sps:$4 sm:$0xff]   ;;  %v4781_v45 = vld [vmem:[#allocation2 + $0x16c] ss:$16 sps:$4 sm:$0xff]   ;;  %v4783_v47 = vld [vmem:[#allocation2 + $0x160] ss:$16 sps:$4 sm:$0xff]  }
  0x46   :  { %v75_v46 = vld [vmem:[%s5863_s0] sm:$0xff]  ;;  %v4784_v49 = vld [vmem:[#allocation2 + $0x168] ss:$16 sps:$4 sm:$0xff]   ;;  %v4787_v51 = vld [vmem:[#allocation2 + $0x18c] ss:$16 sps:$4 sm:$0xff]   ;;  %s5572_s25 = smov [#allocation8]  }
  0x47   :  { %v4091_v48 = vcombine.high %v75_v46, %v75_v46  ;;  %v4785_v50 = vld [vmem:[#allocation2 + $0x184] ss:$16 sps:$4 sm:$0xff]   ;;  %v4789_v52 = vld [vmem:[#allocation2 + $0x180] ss:$16 sps:$4 sm:$0xff]   ;;  %v4790_v53 = vld [vmem:[#allocation2 + $0x188] ss:$16 sps:$4 sm:$0xff]   ;;  %v4090_v4 = vcombine.low %v75_v46, %v75_v46 }
  0x48   :  { %1479 = vmatpush1.bf16.msra.mxu0 %v4741_v18  ;;  %1643 = vmatpush1.bf16.msra.mxu1 %v4742_v19  ;;  %v4791_v54 = vld [vmem:[#allocation2 + $0x1a4] ss:$16 sps:$4 sm:$0xff]   ;;  %v4793_v55 = vld [vmem:[#allocation2 + $0x1ac] ss:$16 sps:$4 sm:$0xff]   ;;  %v4795_v56 = vld [vmem:[#allocation2 + $0x1a0] ss:$16 sps:$4 sm:$0xff]  }
  0x49   :  { %1480 = vmatprep.subr.bf16.mxu0 %v4743_v20  ;;  %1644 = vmatprep.subr.bf16.mxu1 %v4745_v21  ;;  %v4796_v57 = vld [vmem:[#allocation2 + $0x1a8] ss:$16 sps:$4 sm:$0xff]   ;;  %v4797_v58 = vld [vmem:[#allocation2 + $0x1c4] ss:$16 sps:$4 sm:$0xff]   ;;  %v4799_v59 = vld [vmem:[#allocation2 + $0x1cc] ss:$16 sps:$4 sm:$0xff]  }
  0x4a   :  { %1502 = vmatprep.mubr.bf16.mxu0 %v4091_v48  ;;  %1666 = vmatprep.mubr.bf16.mxu1 %v4091_v48  ;;  %v4801_v60 = vld [vmem:[#allocation2 + $0x1c0] ss:$16 sps:$4 sm:$0xff]   ;;  %v4802_v61 = vld [vmem:[#allocation2 + $0x1c8] ss:$16 sps:$4 sm:$0xff]   ;;  %v4803_v62 = vld [vmem:[#allocation2 + $0x1e4] ss:$16 sps:$4 sm:$0xff]  }
  0x4b   :  { %v4805_v63 = vld [vmem:[#allocation2 + $0x1ec] ss:$16 sps:$4 sm:$0xff]   ;;  %v4807_v0 = vld [vmem:[#allocation2 + $0x1e0] ss:$16 sps:$4 sm:$0xff]   ;;  %v4808_v1 = vld [vmem:[#allocation2 + $0x1e8] ss:$16 sps:$4 sm:$0xff]  }
  0x4c   :  { %1481 = vmatpush1.bf16.msra.mxu0 %v4747_v22  ;;  %1645 = vmatpush1.bf16.msra.mxu1 %v4748_v23  ;;  %v4813_v2 = vld [vmem:[#allocation2 + $0x204] ss:$16 sps:$4 sm:$0xff]   ;;  %v4816_v3 = vld [vmem:[#allocation2 + $0x20c] ss:$16 sps:$4 sm:$0xff]   ;;  %v4811_v5 = vld [vmem:[#allocation2 + $0x200] ss:$16 sps:$4 sm:$0xff]  }
  0x4d   :  { %1482 = vmatprep.subr.bf16.mxu0 %v4749_v24  ;;  %1646 = vmatprep.subr.bf16.mxu1 %v4751_v25  ;;  %v4814_v6 = vld [vmem:[#allocation2 + $0x208] ss:$16 sps:$4 sm:$0xff]   ;;  %v4819_v7 = vld [vmem:[#allocation2 + $0x224] ss:$16 sps:$4 sm:$0xff]   ;;  %v4822_v8 = vld [vmem:[#allocation2 + $0x22c] ss:$16 sps:$4 sm:$0xff]  }
  0x4e   :  { %v4817_v9 = vld [vmem:[#allocation2 + $0x220] ss:$16 sps:$4 sm:$0xff]   ;;  %v4820_v10 = vld [vmem:[#allocation2 + $0x228] ss:$16 sps:$4 sm:$0xff]   ;;  %v4825_v11 = vld [vmem:[#allocation2 + $0x244] ss:$16 sps:$4 sm:$0xff]  }
  0x4f   :  { %v4828_v12 = vld [vmem:[#allocation2 + $0x24c] ss:$16 sps:$4 sm:$0xff]   ;;  %v4823_v13 = vld [vmem:[#allocation2 + $0x240] ss:$16 sps:$4 sm:$0xff]   ;;  %v4826_v14 = vld [vmem:[#allocation2 + $0x248] ss:$16 sps:$4 sm:$0xff]  }
  0x50   :  { %1483 = vmatpush1.bf16.msra.mxu0 %v4753_v26  ;;  %1647 = vmatpush1.bf16.msra.mxu1 %v4754_v27  ;;  %v4831_v15 = vld [vmem:[#allocation2 + $0x264] ss:$16 sps:$4 sm:$0xff]   ;;  %v4834_v16 = vld [vmem:[#allocation2 + $0x26c] ss:$16 sps:$4 sm:$0xff]   ;;  %v4829_v17 = vld [vmem:[#allocation2 + $0x260] ss:$16 sps:$4 sm:$0xff]  }
  0x51   :  { %1484 = vmatprep.subr.bf16.mxu0 %v4755_v28  ;;  %1648 = vmatprep.subr.bf16.mxu1 %v4757_v29  ;;  %v4832_v18 = vld [vmem:[#allocation2 + $0x268] ss:$16 sps:$4 sm:$0xff]   ;;  %v4837_v19 = vld [vmem:[#allocation2 + $0x284] ss:$16 sps:$4 sm:$0xff]   ;;  %v4840_v20 = vld [vmem:[#allocation2 + $0x28c] ss:$16 sps:$4 sm:$0xff]  }
  0x52   :  { %v4835_v21 = vld [vmem:[#allocation2 + $0x280] ss:$16 sps:$4 sm:$0xff]   ;;  %v4838_v22 = vld [vmem:[#allocation2 + $0x288] ss:$16 sps:$4 sm:$0xff]   ;;  %v4843_v23 = vld [vmem:[#allocation2 + $0x2a4] ss:$16 sps:$4 sm:$0xff]  }
  0x53   :  { %v4846_v24 = vld [vmem:[#allocation2 + $0x2ac] ss:$16 sps:$4 sm:$0xff]   ;;  %v4841_v25 = vld [vmem:[#allocation2 + $0x2a0] ss:$16 sps:$4 sm:$0xff]   ;;  %v4844_v26 = vld [vmem:[#allocation2 + $0x2a8] ss:$16 sps:$4 sm:$0xff]  }
  0x54   :  { %1485 = vmatpush1.bf16.msra.mxu0 %v4759_v30  ;;  %1649 = vmatpush1.bf16.msra.mxu1 %v4760_v31  ;;  %v4849_v27 = vld [vmem:[#allocation2 + $0x2c4] ss:$16 sps:$4 sm:$0xff]   ;;  %v4852_v28 = vld [vmem:[#allocation2 + $0x2cc] ss:$16 sps:$4 sm:$0xff]   ;;  %v4847_v31 = vld [vmem:[#allocation2 + $0x2c0] ss:$16 sps:$4 sm:$0xff]  }
  0x55   :  { %1486 = vmatprep.subr.bf16.mxu0 %v4761_v32  ;;  %1650 = vmatprep.subr.bf16.mxu1 %v4763_v33  ;;  %v5681_v29 = vld [vmem:[%s5863_s0 + $0x8] sm:$0xff]  ;;  %v4855_v33 = vld [vmem:[#allocation2 + $0x2e4] ss:$16 sps:$4 sm:$0xff]   ;;  %s4080_s1 = sshll.u32 %s5572_s25, 4  ;;  %s4081_s1 = int_to_ptr.vmem [resolvable:$true] %s4080_s1 }
  0x56   :  { %v4093_v30 = vcombine.high %v5681_v29, %v5681_v29  ;;  %v4850_v32 = vld [vmem:[#allocation2 + $0x2c8] ss:$16 sps:$4 sm:$0xff]   ;;  %v4876_v46 = vld [vmem:[#allocation2 + $0x34c] ss:$16 sps:$4 sm:$0xff]   ;;  %s5538_s12 = scalar_lea.vmem %s4081_s1, 128  ;;  %p5543_p11 = scmp.lt.s32.totalorder %s4081_s1, %s4081_s1 }
  0x57   :  { %v4874_v48 = vld [vmem:[#allocation2 + $0x348] ss:$16 sps:$4 sm:$0xff]   ;;  %p5539_p10 = scmp.ne.s32.totalorder %s4081_s1, %s5538_s12  ;;  %p5544_p12 = scmp.lt.s32.totalorder %s5538_s12, %s5538_s12 }
  0x58   :  { %1487 = vmatpush1.bf16.msra.mxu0 %v4765_v34  ;;  %1651 = vmatpush1.bf16.msra.mxu1 %v4766_v35  ;;  %v4858_v34 = vld [vmem:[#allocation2 + $0x2ec] ss:$16 sps:$4 sm:$0xff]   ;;  %v4853_v35 = vld [vmem:[#allocation2 + $0x2e0] ss:$16 sps:$4 sm:$0xff]  }
  0x59   :  { %1488 = vmatprep.subr.bf16.mxu0 %v4767_v36  ;;  %1652 = vmatprep.subr.bf16.mxu1 %v4769_v37  ;;  %v4856_v36 = vld [vmem:[#allocation2 + $0x2e8] ss:$16 sps:$4 sm:$0xff]   ;;  %v4861_v37 = vld [vmem:[#allocation2 + $0x304] ss:$16 sps:$4 sm:$0xff]   ;;  %p5545_p13 = por %p5544_p12, %p5543_p11 }
  0x5b   :  { %p5546_p0 = pnand %p5545_p13, %p5539_p10 }
  0x5c   :  { %1489 = vmatpush1.bf16.msra.mxu0 %v4771_v38  ;;  %1653 = vmatpush1.bf16.msra.mxu1 %v4772_v39  ;;  %v4864_v38 = vld [vmem:[#allocation2 + $0x30c] ss:$16 sps:$4 sm:$0xff]   ;;  %v4859_v39 = vld [vmem:[#allocation2 + $0x300] ss:$16 sps:$4 sm:$0xff]  }
  0x5d   :  { %1490 = vmatprep.subr.bf16.mxu0 %v4773_v40  ;;  %1654 = vmatprep.subr.bf16.mxu1 %v4775_v41  ;;  %v4862_v40 = vld [vmem:[#allocation2 + $0x308] ss:$16 sps:$4 sm:$0xff]   ;;  %v4867_v41 = vld [vmem:[#allocation2 + $0x324] ss:$16 sps:$4 sm:$0xff]  }
  0x60   :  { %1491 = vmatpush1.bf16.msra.mxu0 %v4777_v42  ;;  %1655 = vmatpush1.bf16.msra.mxu1 %v4778_v43  ;;  %v4870_v42 = vld [vmem:[#allocation2 + $0x32c] ss:$16 sps:$4 sm:$0xff]   ;;  %v4865_v43 = vld [vmem:[#allocation2 + $0x320] ss:$16 sps:$4 sm:$0xff]  }
  0x61   :  { %1492 = vmatprep.subr.bf16.mxu0 %v4779_v44  ;;  %1656 = vmatprep.subr.bf16.mxu1 %v4781_v45  ;;  %v4868_v44 = vld [vmem:[#allocation2 + $0x328] ss:$16 sps:$4 sm:$0xff]   ;;  %v4873_v45 = vld [vmem:[#allocation2 + $0x344] ss:$16 sps:$4 sm:$0xff]  }
  0x64   :  { %1493 = vmatpush1.bf16.msra.mxu0 %v4783_v47  ;;  %1657 = vmatpush1.bf16.msra.mxu1 %v4784_v49  ;;  %v4871_v47 = vld [vmem:[#allocation2 + $0x340] ss:$16 sps:$4 sm:$0xff]   ;;  %v4879_v49 = vld [vmem:[#allocation2 + $0x364] ss:$16 sps:$4 sm:$0xff]  }
  0x65   :  { %1494 = vmatprep.subr.bf16.mxu0 %v4785_v50  ;;  %1658 = vmatprep.subr.bf16.mxu1 %v4787_v51  ;;  %v4882_v50 = vld [vmem:[#allocation2 + $0x36c] ss:$16 sps:$4 sm:$0xff]   ;;  %v4877_v51 = vld [vmem:[#allocation2 + $0x360] ss:$16 sps:$4 sm:$0xff]  }
  0x68   :  { %1495 = vmatpush1.bf16.msra.mxu0 %v4789_v52  ;;  %1659 = vmatpush1.bf16.msra.mxu1 %v4790_v53  ;;  %v4880_v52 = vld [vmem:[#allocation2 + $0x368] ss:$16 sps:$4 sm:$0xff]   ;;  %v4885_v53 = vld [vmem:[#allocation2 + $0x384] ss:$16 sps:$4 sm:$0xff]  }
  0x69   :  { %1496 = vmatprep.subr.bf16.mxu0 %v4791_v54  ;;  %1660 = vmatprep.subr.bf16.mxu1 %v4793_v55  ;;  %v4888_v54 = vld [vmem:[#allocation2 + $0x38c] ss:$16 sps:$4 sm:$0xff]   ;;  %v4883_v55 = vld [vmem:[#allocation2 + $0x380] ss:$16 sps:$4 sm:$0xff]  }
  0x6c   :  { %1497 = vmatpush1.bf16.msra.mxu0 %v4795_v56  ;;  %1661 = vmatpush1.bf16.msra.mxu1 %v4796_v57  ;;  %v4886_v56 = vld [vmem:[#allocation2 + $0x388] ss:$16 sps:$4 sm:$0xff]   ;;  %v4891_v57 = vld [vmem:[#allocation2 + $0x3a4] ss:$16 sps:$4 sm:$0xff]  }
  0x6d   :  { %1498 = vmatprep.subr.bf16.mxu0 %v4797_v58  ;;  %1662 = vmatprep.subr.bf16.mxu1 %v4799_v59  ;;  %v4894_v58 = vld [vmem:[#allocation2 + $0x3ac] ss:$16 sps:$4 sm:$0xff]   ;;  %v4889_v59 = vld [vmem:[#allocation2 + $0x3a0] ss:$16 sps:$4 sm:$0xff]  }
  0x70   :  { %1499 = vmatpush1.bf16.msra.mxu0 %v4801_v60  ;;  %1663 = vmatpush1.bf16.msra.mxu1 %v4802_v61  ;;  %v4892_v60 = vld [vmem:[#allocation2 + $0x3a8] ss:$16 sps:$4 sm:$0xff]   ;;  %v4897_v61 = vld [vmem:[#allocation2 + $0x3c4] ss:$16 sps:$4 sm:$0xff]  }
  0x71   :  { %1500 = vmatprep.subr.bf16.mxu0 %v4803_v62  ;;  %1664 = vmatprep.subr.bf16.mxu1 %v4805_v63  ;;  %v4900_v62 = vld [vmem:[#allocation2 + $0x3cc] ss:$16 sps:$4 sm:$0xff]   ;;  %v4895_v63 = vld [vmem:[#allocation2 + $0x3c0] ss:$16 sps:$4 sm:$0xff]  }
  0x74   :  { %1501 = vmatpush1.bf16.msra.mxu0 %v4807_v0  ;;  %1665 = vmatpush1.bf16.msra.mxu1 %v4808_v1  ;;  %v4898_v0 = vld [vmem:[#allocation2 + $0x3c8] ss:$16 sps:$4 sm:$0xff]   ;;  %v4903_v1 = vld [vmem:[#allocation2 + $0x3e4] ss:$16 sps:$4 sm:$0xff]  }
  0x75   :  { %1511 = vmatprep.subr.bf16.mxu0 %v4813_v2  ;;  %1675 = vmatprep.subr.bf16.mxu1 %v4816_v3  ;;  %v4906_v2 = vld [vmem:[#allocation2 + $0x3ec] ss:$16 sps:$4 sm:$0xff]   ;;  %v4901_v3 = vld [vmem:[#allocation2 + $0x3e0] ss:$16 sps:$4 sm:$0xff]  }
  0x77   :  { %1503 = vmatmul.mubr.bf16.vlgmr.msra.gmra.mrb[0].mxu0 %v4090_v4  ;;  %1667 = vmatmul.mubr.bf16.vlgmr.msra.gmra.mrb[0].mxu1 %v4090_v4  ;;  %v4904_v4 = vld [vmem:[#allocation2 + $0x3e8] ss:$16 sps:$4 sm:$0xff]  }
  0x78   :  { %1512 = vmatpush1.bf16.msra.mxu0 %v4811_v5  ;;  %1676 = vmatpush1.bf16.msra.mxu1 %v4814_v6  ;;  %v4911_v5 = vld [vmem:[#allocation2 + $0x404] ss:$16 sps:$4 sm:$0xff]   ;;  %v4914_v6 = vld [vmem:[#allocation2 + $0x40c] ss:$16 sps:$4 sm:$0xff]  }
  0x79   :  { %1513 = vmatprep.subr.bf16.mxu0 %v4819_v7  ;;  %1677 = vmatprep.subr.bf16.mxu1 %v4822_v8  ;;  %v4092_v7 = vcombine.low %v5681_v29, %v5681_v29  ;;  %v4909_v8 = vld [vmem:[#allocation2 + $0x400] ss:$16 sps:$4 sm:$0xff]   ;;  %v4944_v29 = vld [vmem:[#allocation2 + $0x4ac] ss:$16 sps:$4 sm:$0xff]  }
  0x7a   :  { %1543 = vmatprep.mubr.bf16.mxu0 %v4093_v30  ;;  %1707 = vmatprep.mubr.bf16.mxu1 %v4093_v30  ;;  %v4939_v30 = vld [vmem:[#allocation2 + $0x4a0] ss:$16 sps:$4 sm:$0xff]  }
  0x7c   :  { %1514 = vmatpush1.bf16.msra.mxu0 %v4817_v9  ;;  %1678 = vmatpush1.bf16.msra.mxu1 %v4820_v10  ;;  %v4912_v9 = vld [vmem:[#allocation2 + $0x408] ss:$16 sps:$4 sm:$0xff]   ;;  %v4917_v10 = vld [vmem:[#allocation2 + $0x424] ss:$16 sps:$4 sm:$0xff]  }
  0x7d   :  { %1515 = vmatprep.subr.bf16.mxu0 %v4825_v11  ;;  %1679 = vmatprep.subr.bf16.mxu1 %v4828_v12  ;;  %v5690_v11 = vld [vmem:[%s5863_s0 + $0x10] sm:$0xff]  ;;  %v4920_v12 = vld [vmem:[#allocation2 + $0x42c] ss:$16 sps:$4 sm:$0xff]  }
  0x80   :  { %1516 = vmatpush1.bf16.msra.mxu0 %v4823_v13  ;;  %1680 = vmatpush1.bf16.msra.mxu1 %v4826_v14  ;;  %v4095_v13 = vcombine.high %v5690_v11, %v5690_v11  ;;  %v4915_v14 = vld [vmem:[#allocation2 + $0x420] ss:$16 sps:$4 sm:$0xff]  }
  0x81   :  { %1517 = vmatprep.subr.bf16.mxu0 %v4831_v15  ;;  %1681 = vmatprep.subr.bf16.mxu1 %v4834_v16  ;;  %v4918_v15 = vld [vmem:[#allocation2 + $0x428] ss:$16 sps:$4 sm:$0xff]   ;;  %v4923_v16 = vld [vmem:[#allocation2 + $0x444] ss:$16 sps:$4 sm:$0xff]  }
  0x84   :  { %1518 = vmatpush1.bf16.msra.mxu0 %v4829_v17  ;;  %1682 = vmatpush1.bf16.msra.mxu1 %v4832_v18  ;;  %v4926_v17 = vld [vmem:[#allocation2 + $0x44c] ss:$16 sps:$4 sm:$0xff]   ;;  %v4921_v18 = vld [vmem:[#allocation2 + $0x440] ss:$16 sps:$4 sm:$0xff]  }
  0x85   :  { %1519 = vmatprep.subr.bf16.mxu0 %v4837_v19  ;;  %1683 = vmatprep.subr.bf16.mxu1 %v4840_v20  ;;  %v4924_v19 = vld [vmem:[#allocation2 + $0x448] ss:$16 sps:$4 sm:$0xff]   ;;  %v4929_v20 = vld [vmem:[#allocation2 + $0x464] ss:$16 sps:$4 sm:$0xff]  }
  0x88   :  { %1520 = vmatpush1.bf16.msra.mxu0 %v4835_v21  ;;  %1684 = vmatpush1.bf16.msra.mxu1 %v4838_v22  ;;  %v4932_v21 = vld [vmem:[#allocation2 + $0x46c] ss:$16 sps:$4 sm:$0xff]   ;;  %v4927_v22 = vld [vmem:[#allocation2 + $0x460] ss:$16 sps:$4 sm:$0xff]  }
  0x89   :  { %1521 = vmatprep.subr.bf16.mxu0 %v4843_v23  ;;  %1685 = vmatprep.subr.bf16.mxu1 %v4846_v24  ;;  %v4930_v23 = vld [vmem:[#allocation2 + $0x468] ss:$16 sps:$4 sm:$0xff]   ;;  %v4935_v24 = vld [vmem:[#allocation2 + $0x484] ss:$16 sps:$4 sm:$0xff]  }
  0x8c   :  { %1522 = vmatpush1.bf16.msra.mxu0 %v4841_v25  ;;  %1686 = vmatpush1.bf16.msra.mxu1 %v4844_v26  ;;  %v4938_v25 = vld [vmem:[#allocation2 + $0x48c] ss:$16 sps:$4 sm:$0xff]   ;;  %v4933_v26 = vld [vmem:[#allocation2 + $0x480] ss:$16 sps:$4 sm:$0xff]  }
  0x8d   :  { %1523 = vmatprep.subr.bf16.mxu0 %v4849_v27  ;;  %1687 = vmatprep.subr.bf16.mxu1 %v4852_v28  ;;  %v4936_v27 = vld [vmem:[#allocation2 + $0x488] ss:$16 sps:$4 sm:$0xff]   ;;  %v4941_v28 = vld [vmem:[#allocation2 + $0x4a4] ss:$16 sps:$4 sm:$0xff]  }
  0x90   :  { %1524 = vmatpush1.bf16.msra.mxu0 %v4847_v31  ;;  %1688 = vmatpush1.bf16.msra.mxu1 %v4850_v32  ;;  %v4942_v31 = vld [vmem:[#allocation2 + $0x4a8] ss:$16 sps:$4 sm:$0xff]   ;;  %v4947_v32 = vld [vmem:[#allocation2 + $0x4c4] ss:$16 sps:$4 sm:$0xff]  }
  0x91   :  { %1525 = vmatprep.subr.bf16.mxu0 %v4855_v33  ;;  %1689 = vmatprep.subr.bf16.mxu1 %v4858_v34  ;;  %v4950_v33 = vld [vmem:[#allocation2 + $0x4cc] ss:$16 sps:$4 sm:$0xff]   ;;  %v4945_v34 = vld [vmem:[#allocation2 + $0x4c0] ss:$16 sps:$4 sm:$0xff]  }
  0x94   :  { %1526 = vmatpush1.bf16.msra.mxu0 %v4853_v35  ;;  %1690 = vmatpush1.bf16.msra.mxu1 %v4856_v36  ;;  %v4948_v35 = vld [vmem:[#allocation2 + $0x4c8] ss:$16 sps:$4 sm:$0xff]   ;;  %v4953_v36 = vld [vmem:[#allocation2 + $0x4e4] ss:$16 sps:$4 sm:$0xff]  }
  0x95   :  { %1527 = vmatprep.subr.bf16.mxu0 %v4861_v37  ;;  %1691 = vmatprep.subr.bf16.mxu1 %v4864_v38  ;;  %v4956_v37 = vld [vmem:[#allocation2 + $0x4ec] ss:$16 sps:$4 sm:$0xff]   ;;  %v4951_v38 = vld [vmem:[#allocation2 + $0x4e0] ss:$16 sps:$4 sm:$0xff]  }
  0x98   :  { %1528 = vmatpush1.bf16.msra.mxu0 %v4859_v39  ;;  %1692 = vmatpush1.bf16.msra.mxu1 %v4862_v40  ;;  %v4954_v39 = vld [vmem:[#allocation2 + $0x4e8] ss:$16 sps:$4 sm:$0xff]   ;;  %v4959_v40 = vld [vmem:[#allocation2 + $0x504] ss:$16 sps:$4 sm:$0xff]  }
  0x99   :  { %1529 = vmatprep.subr.bf16.mxu0 %v4867_v41  ;;  %1693 = vmatprep.subr.bf16.mxu1 %v4870_v42  ;;  %v4962_v41 = vld [vmem:[#allocation2 + $0x50c] ss:$16 sps:$4 sm:$0xff]   ;;  %v4957_v42 = vld [vmem:[#allocation2 + $0x500] ss:$16 sps:$4 sm:$0xff]  }
  0x9c   :  { %1530 = vmatpush1.bf16.msra.mxu0 %v4865_v43  ;;  %1694 = vmatpush1.bf16.msra.mxu1 %v4868_v44  ;;  %v4960_v43 = vld [vmem:[#allocation2 + $0x508] ss:$16 sps:$4 sm:$0xff]   ;;  %v4965_v44 = vld [vmem:[#allocation2 + $0x524] ss:$16 sps:$4 sm:$0xff]  }
  0x9d   :  { %1531 = vmatprep.subr.bf16.mxu0 %v4873_v45  ;;  %1695 = vmatprep.subr.bf16.mxu1 %v4876_v46  ;;  %v4968_v45 = vld [vmem:[#allocation2 + $0x52c] ss:$16 sps:$4 sm:$0xff]   ;;  %v4963_v46 = vld [vmem:[#allocation2 + $0x520] ss:$16 sps:$4 sm:$0xff]  }
  0xa0   :  { %1532 = vmatpush1.bf16.msra.mxu0 %v4871_v47  ;;  %1696 = vmatpush1.bf16.msra.mxu1 %v4874_v48  ;;  %v4966_v47 = vld [vmem:[#allocation2 + $0x528] ss:$16 sps:$4 sm:$0xff]   ;;  %v4971_v48 = vld [vmem:[#allocation2 + $0x544] ss:$16 sps:$4 sm:$0xff]  }
  0xa1   :  { %1533 = vmatprep.subr.bf16.mxu0 %v4879_v49  ;;  %1697 = vmatprep.subr.bf16.mxu1 %v4882_v50  ;;  %v4974_v49 = vld [vmem:[#allocation2 + $0x54c] ss:$16 sps:$4 sm:$0xff]   ;;  %v4969_v50 = vld [vmem:[#allocation2 + $0x540] ss:$16 sps:$4 sm:$0xff]  }
  0xa4   :  { %1534 = vmatpush1.bf16.msra.mxu0 %v4877_v51  ;;  %1698 = vmatpush1.bf16.msra.mxu1 %v4880_v52  ;;  %v4972_v51 = vld [vmem:[#allocation2 + $0x548] ss:$16 sps:$4 sm:$0xff]   ;;  %v4977_v52 = vld [vmem:[#allocation2 + $0x564] ss:$16 sps:$4 sm:$0xff]  }
  0xa5   :  { %1535 = vmatprep.subr.bf16.mxu0 %v4885_v53  ;;  %1699 = vmatprep.subr.bf16.mxu1 %v4888_v54  ;;  %v4980_v53 = vld [vmem:[#allocation2 + $0x56c] ss:$16 sps:$4 sm:$0xff]   ;;  %v4975_v54 = vld [vmem:[#allocation2 + $0x560] ss:$16 sps:$4 sm:$0xff]  }
  0xa8   :  { %1536 = vmatpush1.bf16.msra.mxu0 %v4883_v55  ;;  %1700 = vmatpush1.bf16.msra.mxu1 %v4886_v56  ;;  %v4978_v55 = vld [vmem:[#allocation2 + $0x568] ss:$16 sps:$4 sm:$0xff]   ;;  %v4983_v56 = vld [vmem:[#allocation2 + $0x584] ss:$16 sps:$4 sm:$0xff]  }
  0xa9   :  { %1537 = vmatprep.subr.bf16.mxu0 %v4891_v57  ;;  %1701 = vmatprep.subr.bf16.mxu1 %v4894_v58  ;;  %v4986_v57 = vld [vmem:[#allocation2 + $0x58c] ss:$16 sps:$4 sm:$0xff]   ;;  %v4981_v58 = vld [vmem:[#allocation2 + $0x580] ss:$16 sps:$4 sm:$0xff]  }
  0xac   :  { %1538 = vmatpush1.bf16.msra.mxu0 %v4889_v59  ;;  %1702 = vmatpush1.bf16.msra.mxu1 %v4892_v60  ;;  %v4984_v59 = vld [vmem:[#allocation2 + $0x588] ss:$16 sps:$4 sm:$0xff]   ;;  %v4989_v60 = vld [vmem:[#allocation2 + $0x5a4] ss:$16 sps:$4 sm:$0xff]  }
  0xad   :  { %1539 = vmatprep.subr.bf16.mxu0 %v4897_v61  ;;  %1703 = vmatprep.subr.bf16.mxu1 %v4900_v62  ;;  %v4992_v61 = vld [vmem:[#allocation2 + $0x5ac] ss:$16 sps:$4 sm:$0xff]   ;;  %v4987_v62 = vld [vmem:[#allocation2 + $0x5a0] ss:$16 sps:$4 sm:$0xff]  }
  0xb0   :  { %1540 = vmatpush1.bf16.msra.mxu0 %v4895_v63  ;;  %1704 = vmatpush1.bf16.msra.mxu1 %v4898_v0  ;;  %v4990_v63 = vld [vmem:[#allocation2 + $0x5a8] ss:$16 sps:$4 sm:$0xff]   ;;  %v4995_v0 = vld [vmem:[#allocation2 + $0x5c4] ss:$16 sps:$4 sm:$0xff]  }
  0xb1   :  { %1541 = vmatprep.subr.bf16.mxu0 %v4903_v1  ;;  %1705 = vmatprep.subr.bf16.mxu1 %v4906_v2  ;;  %v4998_v1 = vld [vmem:[#allocation2 + $0x5cc] ss:$16 sps:$4 sm:$0xff]   ;;  %v4993_v2 = vld [vmem:[#allocation2 + $0x5c0] ss:$16 sps:$4 sm:$0xff]  }
  0xb4   :  { %1542 = vmatpush1.bf16.msra.mxu0 %v4901_v3  ;;  %1706 = vmatpush1.bf16.msra.mxu1 %v4904_v4  ;;  %v4996_v3 = vld [vmem:[#allocation2 + $0x5c8] ss:$16 sps:$4 sm:$0xff]   ;;  %v5001_v4 = vld [vmem:[#allocation2 + $0x5e4] ss:$16 sps:$4 sm:$0xff]  }
  0xb5   :  { %1552 = vmatprep.subr.bf16.mxu0 %v4911_v5  ;;  %1716 = vmatprep.subr.bf16.mxu1 %v4914_v6  ;;  %v5004_v5 = vld [vmem:[#allocation2 + $0x5ec] ss:$16 sps:$4 sm:$0xff]   ;;  %v4999_v6 = vld [vmem:[#allocation2 + $0x5e0] ss:$16 sps:$4 sm:$0xff]  }
  0xb7   :  { %1544 = vmatmul.mubr.bf16.vlgmr.msra.gmra.mrb[0].mxu0 %v4092_v7  ;;  %1708 = vmatmul.mubr.bf16.vlgmr.msra.gmra.mrb[0].mxu1 %v4092_v7  ;;  %v5002_v7 = vld [vmem:[#allocation2 + $0x5e8] ss:$16 sps:$4 sm:$0xff]  }
  0xb8   :  { %1553 = vmatpush1.bf16.msra.mxu0 %v4909_v8  ;;  %1717 = vmatpush1.bf16.msra.mxu1 %v4912_v9  ;;  %v5009_v8 = vld [vmem:[#allocation2 + $0x604] ss:$16 sps:$4 sm:$0xff]   ;;  %v5012_v9 = vld [vmem:[#allocation2 + $0x60c] ss:$16 sps:$4 sm:$0xff]  }
  0xb9   :  { %1554 = vmatprep.subr.bf16.mxu0 %v4917_v10  ;;  %1718 = vmatprep.subr.bf16.mxu1 %v4920_v12  ;;  %v5007_v10 = vld [vmem:[#allocation2 + $0x600] ss:$16 sps:$4 sm:$0xff]   ;;  %v5010_v12 = vld [vmem:[#allocation2 + $0x608] ss:$16 sps:$4 sm:$0xff]  }
  0xba   :  { %1584 = vmatprep.mubr.bf16.mxu0 %v4095_v13  ;;  %1748 = vmatprep.mubr.bf16.mxu1 %v4095_v13  ;;  %v4094_v13 = vcombine.low %v5690_v11, %v5690_v11  ;;  %v5027_v11 = vld [vmem:[#allocation2 + $0x664] ss:$16 sps:$4 sm:$0xff]  }
  0xbc   :  { %1555 = vmatpush1.bf16.msra.mxu0 %v4915_v14  ;;  %1719 = vmatpush1.bf16.msra.mxu1 %v4918_v15  ;;  %v5015_v14 = vld [vmem:[#allocation2 + $0x624] ss:$16 sps:$4 sm:$0xff]   ;;  %v5018_v15 = vld [vmem:[#allocation2 + $0x62c] ss:$16 sps:$4 sm:$0xff]  }
  0xbd   :  { %1556 = vmatprep.subr.bf16.mxu0 %v4923_v16  ;;  %1720 = vmatprep.subr.bf16.mxu1 %v4926_v17  ;;  %v5013_v16 = vld [vmem:[#allocation2 + $0x620] ss:$16 sps:$4 sm:$0xff]   ;;  %v5016_v17 = vld [vmem:[#allocation2 + $0x628] ss:$16 sps:$4 sm:$0xff]  }
  0xc0   :  { %1557 = vmatpush1.bf16.msra.mxu0 %v4921_v18  ;;  %1721 = vmatpush1.bf16.msra.mxu1 %v4924_v19  ;;  %v5021_v18 = vld [vmem:[#allocation2 + $0x644] ss:$16 sps:$4 sm:$0xff]   ;;  %v5024_v19 = vld [vmem:[#allocation2 + $0x64c] ss:$16 sps:$4 sm:$0xff]  }
  0xc1   :  { %1558 = vmatprep.subr.bf16.mxu0 %v4929_v20  ;;  %1722 = vmatprep.subr.bf16.mxu1 %v4932_v21  ;;  %v5019_v20 = vld [vmem:[#allocation2 + $0x640] ss:$16 sps:$4 sm:$0xff]   ;;  %v5022_v21 = vld [vmem:[#allocation2 + $0x648] ss:$16 sps:$4 sm:$0xff]  }
  0xc4   :  { %1559 = vmatpush1.bf16.msra.mxu0 %v4927_v22  ;;  %1723 = vmatpush1.bf16.msra.mxu1 %v4930_v23  ;;  %v5571_v22 = vmov 0   ;;  %v5030_v23 = vld [vmem:[#allocation2 + $0x66c] ss:$16 sps:$4 sm:$0xff]  }
  0xc5   :  { %1560 = vmatprep.subr.bf16.mxu0 %v4935_v24  ;;  %1724 = vmatprep.subr.bf16.mxu1 %v4938_v25  ;;  %v5025_v24 = vld [vmem:[#allocation2 + $0x660] ss:$16 sps:$4 sm:$0xff]   ;;  %v5028_v25 = vld [vmem:[#allocation2 + $0x668] ss:$16 sps:$4 sm:$0xff]  }
  0xc8   :  { %1561 = vmatpush1.bf16.msra.mxu0 %v4933_v26  ;;  %1725 = vmatpush1.bf16.msra.mxu1 %v4936_v27  ;;  %v5033_v26 = vld [vmem:[#allocation2 + $0x684] ss:$16 sps:$4 sm:$0xff]   ;;  %v5036_v27 = vld [vmem:[#allocation2 + $0x68c] ss:$16 sps:$4 sm:$0xff]  }
  0xc9   :  { %1562 = vmatprep.subr.bf16.mxu0 %v4941_v28  ;;  %1726 = vmatprep.subr.bf16.mxu1 %v4944_v29  ;;  %v5031_v28 = vld [vmem:[#allocation2 + $0x680] ss:$16 sps:$4 sm:$0xff]   ;;  %v5034_v29 = vld [vmem:[#allocation2 + $0x688] ss:$16 sps:$4 sm:$0xff]  }
  0xcc   :  { %1563 = vmatpush1.bf16.msra.mxu0 %v4939_v30  ;;  %1727 = vmatpush1.bf16.msra.mxu1 %v4942_v31  ;;  %v5039_v30 = vld [vmem:[#allocation2 + $0x6a4] ss:$16 sps:$4 sm:$0xff]   ;;  %v5042_v31 = vld [vmem:[#allocation2 + $0x6ac] ss:$16 sps:$4 sm:$0xff]  }
  0xcd   :  { %1564 = vmatprep.subr.bf16.mxu0 %v4947_v32  ;;  %1728 = vmatprep.subr.bf16.mxu1 %v4950_v33  ;;  %v5037_v32 = vld [vmem:[#allocation2 + $0x6a0] ss:$16 sps:$4 sm:$0xff]   ;;  %v5040_v33 = vld [vmem:[#allocation2 + $0x6a8] ss:$16 sps:$4 sm:$0xff]  }
  0xd0   :  { %1565 = vmatpush1.bf16.msra.mxu0 %v4945_v34  ;;  %1729 = vmatpush1.bf16.msra.mxu1 %v4948_v35  ;;  %v5045_v34 = vld [vmem:[#allocation2 + $0x6c4] ss:$16 sps:$4 sm:$0xff]   ;;  %v5048_v35 = vld [vmem:[#allocation2 + $0x6cc] ss:$16 sps:$4 sm:$0xff]  }
  0xd1   :  { %1566 = vmatprep.subr.bf16.mxu0 %v4953_v36  ;;  %1730 = vmatprep.subr.bf16.mxu1 %v4956_v37  ;;  %v5043_v36 = vld [vmem:[#allocation2 + $0x6c0] ss:$16 sps:$4 sm:$0xff]   ;;  %v5046_v37 = vld [vmem:[#allocation2 + $0x6c8] ss:$16 sps:$4 sm:$0xff]  }
  0xd4   :  { %1567 = vmatpush1.bf16.msra.mxu0 %v4951_v38  ;;  %1731 = vmatpush1.bf16.msra.mxu1 %v4954_v39  ;;  %v5051_v38 = vld [vmem:[#allocation2 + $0x6e4] ss:$16 sps:$4 sm:$0xff]   ;;  %v5054_v39 = vld [vmem:[#allocation2 + $0x6ec] ss:$16 sps:$4 sm:$0xff]  }
  0xd5   :  { %1568 = vmatprep.subr.bf16.mxu0 %v4959_v40  ;;  %1732 = vmatprep.subr.bf16.mxu1 %v4962_v41  ;;  %v5049_v40 = vld [vmem:[#allocation2 + $0x6e0] ss:$16 sps:$4 sm:$0xff]   ;;  %v5052_v41 = vld [vmem:[#allocation2 + $0x6e8] ss:$16 sps:$4 sm:$0xff]  }
  0xd8   :  { %1569 = vmatpush1.bf16.msra.mxu0 %v4957_v42  ;;  %1733 = vmatpush1.bf16.msra.mxu1 %v4960_v43  ;;  %v5058_v42 = vld [vmem:[#allocation5 + $0x4] ss:$16 sps:$4 sm:$0xff]   ;;  %v5061_v43 = vld [vmem:[#allocation5 + $0xc] ss:$16 sps:$4 sm:$0xff]  }
  0xd9   :  { %1570 = vmatprep.subr.bf16.mxu0 %v4965_v44  ;;  %1734 = vmatprep.subr.bf16.mxu1 %v4968_v45  ;;  %v5055_v44 = vld [vmem:[%s5863_s0 + $0x18] ss:$0 sps:$4 sm:$0xff]   ;;  %v5056_v45 = vld [vmem:[#allocation5] ss:$16 sps:$4 sm:$0xff]  }
  0xdc   :  { %1571 = vmatpush1.bf16.msra.mxu0 %v4963_v46  ;;  %1735 = vmatpush1.bf16.msra.mxu1 %v4966_v47  ;;  %v5059_v46 = vld [vmem:[#allocation5 + $0x8] ss:$16 sps:$4 sm:$0xff]   ;;  %v5064_v47 = vld [vmem:[#allocation5 + $0x24] ss:$16 sps:$4 sm:$0xff]  }
  0xdd   :  { %1572 = vmatprep.subr.bf16.mxu0 %v4971_v48  ;;  %1736 = vmatprep.subr.bf16.mxu1 %v4974_v49  ;;  %v5067_v48 = vld [vmem:[#allocation5 + $0x2c] ss:$16 sps:$4 sm:$0xff]   ;;  %v5062_v49 = vld [vmem:[#allocation5 + $0x20] ss:$16 sps:$4 sm:$0xff]  }
  0xe0   :  { %1573 = vmatpush1.bf16.msra.mxu0 %v4969_v50  ;;  %1737 = vmatpush1.bf16.msra.mxu1 %v4972_v51  ;;  %v5065_v50 = vld [vmem:[#allocation5 + $0x28] ss:$16 sps:$4 sm:$0xff]   ;;  %v5070_v51 = vld [vmem:[#allocation5 + $0x44] ss:$16 sps:$4 sm:$0xff]  }
  0xe1   :  { %1574 = vmatprep.subr.bf16.mxu0 %v4977_v52  ;;  %1738 = vmatprep.subr.bf16.mxu1 %v4980_v53  ;;  %v5073_v52 = vld [vmem:[#allocation5 + $0x4c] ss:$16 sps:$4 sm:$0xff]   ;;  %v5068_v53 = vld [vmem:[#allocation5 + $0x40] ss:$16 sps:$4 sm:$0xff]  }
  0xe4   :  { %1575 = vmatpush1.bf16.msra.mxu0 %v4975_v54  ;;  %1739 = vmatpush1.bf16.msra.mxu1 %v4978_v55  ;;  %v5071_v54 = vld [vmem:[#allocation5 + $0x48] ss:$16 sps:$4 sm:$0xff]   ;;  %v5076_v55 = vld [vmem:[#allocation5 + $0x64] ss:$16 sps:$4 sm:$0xff]  }
  0xe5   :  { %1576 = vmatprep.subr.bf16.mxu0 %v4983_v56  ;;  %1740 = vmatprep.subr.bf16.mxu1 %v4986_v57  ;;  %v5079_v56 = vld [vmem:[#allocation5 + $0x6c] ss:$16 sps:$4 sm:$0xff]   ;;  %v5074_v57 = vld [vmem:[#allocation5 + $0x60] ss:$16 sps:$4 sm:$0xff]  }
  0xe8   :  { %1577 = vmatpush1.bf16.msra.mxu0 %v4981_v58  ;;  %1741 = vmatpush1.bf16.msra.mxu1 %v4984_v59  ;;  %v5077_v58 = vld [vmem:[#allocation5 + $0x68] ss:$16 sps:$4 sm:$0xff]   ;;  %v5082_v59 = vld [vmem:[#allocation5 + $0x84] ss:$16 sps:$4 sm:$0xff]  }
  0xe9   :  { %1578 = vmatprep.subr.bf16.mxu0 %v4989_v60  ;;  %1742 = vmatprep.subr.bf16.mxu1 %v4992_v61  ;;  %v5085_v60 = vld [vmem:[#allocation5 + $0x8c] ss:$16 sps:$4 sm:$0xff]   ;;  %v5080_v61 = vld [vmem:[#allocation5 + $0x80] ss:$16 sps:$4 sm:$0xff]  }
  0xec   :  { %1579 = vmatpush1.bf16.msra.mxu0 %v4987_v62  ;;  %1743 = vmatpush1.bf16.msra.mxu1 %v4990_v63  ;;  %v5083_v62 = vld [vmem:[#allocation5 + $0x88] ss:$16 sps:$4 sm:$0xff]   ;;  %v5088_v63 = vld [vmem:[#allocation5 + $0xa4] ss:$16 sps:$4 sm:$0xff]  }
  0xed   :  { %1580 = vmatprep.subr.bf16.mxu0 %v4995_v0  ;;  %1744 = vmatprep.subr.bf16.mxu1 %v4998_v1  ;;  %v5091_v0 = vld [vmem:[#allocation5 + $0xac] ss:$16 sps:$4 sm:$0xff]   ;;  %v5086_v1 = vld [vmem:[#allocation5 + $0xa0] ss:$16 sps:$4 sm:$0xff]  }
  0xf0   :  { %1581 = vmatpush1.bf16.msra.mxu0 %v4993_v2  ;;  %1745 = vmatpush1.bf16.msra.mxu1 %v4996_v3  ;;  %v5089_v2 = vld [vmem:[#allocation5 + $0xa8] ss:$16 sps:$4 sm:$0xff]   ;;  %v5094_v3 = vld [vmem:[#allocation5 + $0xc4] ss:$16 sps:$4 sm:$0xff]  }
  0xf1   :  { %1582 = vmatprep.subr.bf16.mxu0 %v5001_v4  ;;  %1746 = vmatprep.subr.bf16.mxu1 %v5004_v5  ;;  %v5097_v4 = vld [vmem:[#allocation5 + $0xcc] ss:$16 sps:$4 sm:$0xff]   ;;  %v5092_v5 = vld [vmem:[#allocation5 + $0xc0] ss:$16 sps:$4 sm:$0xff]  }
  0xf4   :  { %1583 = vmatpush1.bf16.msra.mxu0 %v4999_v6  ;;  %1747 = vmatpush1.bf16.msra.mxu1 %v5002_v7  ;;  %v5095_v6 = vld [vmem:[#allocation5 + $0xc8] ss:$16 sps:$4 sm:$0xff]   ;;  %v5100_v7 = vld [vmem:[#allocation5 + $0xe4] ss:$16 sps:$4 sm:$0xff]  }
  0xf5   :  { %1593 = vmatprep.subr.bf16.mxu0 %v5009_v8  ;;  %1757 = vmatprep.subr.bf16.mxu1 %v5012_v9  ;;  %v5103_v8 = vld [vmem:[#allocation5 + $0xec] ss:$16 sps:$4 sm:$0xff]   ;;  %v5098_v9 = vld [vmem:[#allocation5 + $0xe0] ss:$16 sps:$4 sm:$0xff]  }
  0xf7   :  { %1585 = vmatmul.mubr.bf16.vlgmr.msra.gmra.mrb[0].mxu0 %v4094_v13  ;;  %1749 = vmatmul.mubr.bf16.vlgmr.msra.gmra.mrb[0].mxu1 %v4094_v13  ;;  %v5109_v13 = vld [vmem:[#allocation5 + $0x10c] ss:$16 sps:$4 sm:$0xff]  }
  0xf8   :  { %1594 = vmatpush1.bf16.msra.mxu0 %v5007_v10  ;;  %1758 = vmatpush1.bf16.msra.mxu1 %v5010_v12  ;;  %v5101_v10 = vld [vmem:[#allocation5 + $0xe8] ss:$16 sps:$4 sm:$0xff]   ;;  %v5106_v12 = vld [vmem:[#allocation5 + $0x104] ss:$16 sps:$4 sm:$0xff]  }
  0xf9   :  { %1595 = vmatprep.subr.bf16.mxu0 %v5015_v14  ;;  %1759 = vmatprep.subr.bf16.mxu1 %v5018_v15  ;;  %v5104_v14 = vld [vmem:[#allocation5 + $0x100] ss:$16 sps:$4 sm:$0xff]   ;;  %v5107_v15 = vld [vmem:[#allocation5 + $0x108] ss:$16 sps:$4 sm:$0xff]  }
  0xfa   :  { %1625 = vmatprep.mubr.bf16.mxu0 %v5571_v22  ;;  %1789 = vmatprep.mubr.bf16.mxu1 %v5571_v22  ;;  %v5116_v22 = vld [vmem:[#allocation5 + $0x140] ss:$16 sps:$4 sm:$0xff]  }
  0xfc   :  { %1596 = vmatpush1.bf16.msra.mxu0 %v5013_v16  ;;  %1760 = vmatpush1.bf16.msra.mxu1 %v5016_v17  ;;  %v5112_v16 = vld [vmem:[#allocation5 + $0x124] ss:$16 sps:$4 sm:$0xff]   ;;  %v5115_v17 = vld [vmem:[#allocation5 + $0x12c] ss:$16 sps:$4 sm:$0xff]  }
  0xfd   :  { %1597 = vmatprep.subr.bf16.mxu0 %v5021_v18  ;;  %1761 = vmatprep.subr.bf16.mxu1 %v5024_v19  ;;  %v5110_v18 = vld [vmem:[#allocation5 + $0x120] ss:$16 sps:$4 sm:$0xff]   ;;  %v5113_v19 = vld [vmem:[#allocation5 + $0x128] ss:$16 sps:$4 sm:$0xff]  }
 0x100   :  { %1598 = vmatpush1.bf16.msra.mxu0 %v5019_v20  ;;  %1762 = vmatpush1.bf16.msra.mxu1 %v5022_v21  ;;  %v5118_v20 = vld [vmem:[#allocation5 + $0x144] ss:$16 sps:$4 sm:$0xff]   ;;  %v5121_v21 = vld [vmem:[#allocation5 + $0x14c] ss:$16 sps:$4 sm:$0xff]  }
 0x101   :  { %1599 = vmatprep.subr.bf16.mxu0 %v5027_v11  ;;  %1763 = vmatprep.subr.bf16.mxu1 %v5030_v23  ;;  %v5119_v11 = vld [vmem:[#allocation5 + $0x148] ss:$16 sps:$4 sm:$0xff]   ;;  %v5124_v23 = vld [vmem:[#allocation5 + $0x164] ss:$16 sps:$4 sm:$0xff]  }
 0x104   :  { %1600 = vmatpush1.bf16.msra.mxu0 %v5025_v24  ;;  %1764 = vmatpush1.bf16.msra.mxu1 %v5028_v25  ;;  %v5127_v24 = vld [vmem:[#allocation5 + $0x16c] ss:$16 sps:$4 sm:$0xff]   ;;  %v5122_v25 = vld [vmem:[#allocation5 + $0x160] ss:$16 sps:$4 sm:$0xff]  }
 0x105   :  { %1601 = vmatprep.subr.bf16.mxu0 %v5033_v26  ;;  %1765 = vmatprep.subr.bf16.mxu1 %v5036_v27  ;;  %v5125_v26 = vld [vmem:[#allocation5 + $0x168] ss:$16 sps:$4 sm:$0xff]   ;;  %v5130_v27 = vld [vmem:[#allocation5 + $0x184] ss:$16 sps:$4 sm:$0xff]  }
 0x108   :  { %1602 = vmatpush1.bf16.msra.mxu0 %v5031_v28  ;;  %1766 = vmatpush1.bf16.msra.mxu1 %v5034_v29  ;;  %v5133_v28 = vld [vmem:[#allocation5 + $0x18c] ss:$16 sps:$4 sm:$0xff]   ;;  %v5128_v29 = vld [vmem:[#allocation5 + $0x180] ss:$16 sps:$4 sm:$0xff]  }
 0x109   :  { %1603 = vmatprep.subr.bf16.mxu0 %v5039_v30  ;;  %1767 = vmatprep.subr.bf16.mxu1 %v5042_v31  ;;  %v5131_v30 = vld [vmem:[#allocation5 + $0x188] ss:$16 sps:$4 sm:$0xff]   ;;  %v5136_v31 = vld [vmem:[#allocation5 + $0x1a4] ss:$16 sps:$4 sm:$0xff]  }
 0x10c   :  { %1604 = vmatpush1.bf16.msra.mxu0 %v5037_v32  ;;  %1768 = vmatpush1.bf16.msra.mxu1 %v5040_v33  ;;  %v5139_v32 = vld [vmem:[#allocation5 + $0x1ac] ss:$16 sps:$4 sm:$0xff]   ;;  %v5134_v33 = vld [vmem:[#allocation5 + $0x1a0] ss:$16 sps:$4 sm:$0xff]  }
 0x10d   :  { %1605 = vmatprep.subr.bf16.mxu0 %v5045_v34  ;;  %1769 = vmatprep.subr.bf16.mxu1 %v5048_v35  ;;  %v5137_v34 = vld [vmem:[#allocation5 + $0x1a8] ss:$16 sps:$4 sm:$0xff]   ;;  %v5142_v35 = vld [vmem:[#allocation5 + $0x1c4] ss:$16 sps:$4 sm:$0xff]  }
 0x110   :  { %1606 = vmatpush1.bf16.msra.mxu0 %v5043_v36  ;;  %1770 = vmatpush1.bf16.msra.mxu1 %v5046_v37  ;;  %v5145_v36 = vld [vmem:[#allocation5 + $0x1cc] ss:$16 sps:$4 sm:$0xff]   ;;  %v5140_v37 = vld [vmem:[#allocation5 + $0x1c0] ss:$16 sps:$4 sm:$0xff]  }
 0x111   :  { %1607 = vmatprep.subr.bf16.mxu0 %v5051_v38  ;;  %1771 = vmatprep.subr.bf16.mxu1 %v5054_v39  ;;  %v5143_v38 = vld [vmem:[#allocation5 + $0x1c8] ss:$16 sps:$4 sm:$0xff]   ;;  %v5148_v39 = vld [vmem:[#allocation5 + $0x1e4] ss:$16 sps:$4 sm:$0xff]  }
 0x114   :  { %1608 = vmatpush1.bf16.msra.mxu0 %v5049_v40  ;;  %1772 = vmatpush1.bf16.msra.mxu1 %v5052_v41  ;;  %v5151_v40 = vld [vmem:[#allocation5 + $0x1ec] ss:$16 sps:$4 sm:$0xff]   ;;  %v5146_v41 = vld [vmem:[#allocation5 + $0x1e0] ss:$16 sps:$4 sm:$0xff]  }
 0x115   :  { %2596 = vmatprep.subr.bf16.mxu0 %v5058_v42  ;;  %2678 = vmatprep.subr.bf16.mxu1 %v5061_v43  ;;  %v5149_v42 = vld [vmem:[#allocation5 + $0x1e8] ss:$16 sps:$4 sm:$0xff]   ;;  %v5154_v43 = vld [vmem:[#allocation5 + $0x204] ss:$16 sps:$4 sm:$0xff]  }
 0x117   :  { %1626 = vmatmul.mubr.bf16.vlgmr.msra.gmra.mrb[0].mxu0 %v5055_v44  ;;  %1790 = vmatmul.mubr.bf16.vlgmr.msra.gmra.mrb[0].mxu1 %v5055_v44  ;;  %v5157_v44 = vld [vmem:[#allocation5 + $0x20c] ss:$16 sps:$4 sm:$0xff]  }
 0x118   :  { %2597 = vmatpush1.bf16.msra.mxu0 %v5056_v45  ;;  %2679 = vmatpush1.bf16.msra.mxu1 %v5059_v46  ;;  %v305_v45 = vlaneseq }
 0x119   :  { %2598 = vmatprep.subr.bf16.mxu0 %v5064_v47  ;;  %2680 = vmatprep.subr.bf16.mxu1 %v5067_v48  ;;  %v5707_v48 = vld [vmem:[%s5865_s2] sm:$0xf] }
 0x11a   :  { %v5699_v46 = vshrl.u32 %v305_v45, 7  ;;  %v5214_v45 = vld [vmem:[#allocation5 + $0x344] ss:$16 sps:$4 sm:$0xff]  }
 0x11c   :  { %2599 = vmatpush1.bf16.msra.mxu0 %v5062_v49  ;;  %2681 = vmatpush1.bf16.msra.mxu1 %v5065_v50  ;;  %v5702_v47 = vsub.s32 0, %v5699_v46  ;;  %v5710_v49 = vsub.s32 1, %v5699_v46  ;;  %v5713_v50 = vsub.s32 3, %v5699_v46 }
 0x11d   :  { %2600 = vmatprep.subr.bf16.mxu0 %v5070_v51  ;;  %2682 = vmatprep.subr.bf16.mxu1 %v5073_v52 }
 0x11e   :  { %v308_v51 = vrot.slane %v5707_v48, %v5702_v47  ;;  %v312_v52 = vrot.slane %v5707_v48, %v5710_v49 }
 0x120   :  { %2601 = vmatpush1.bf16.msra.mxu0 %v5068_v53  ;;  %2683 = vmatpush1.bf16.msra.mxu1 %v5071_v54  ;;  %v320_v53 = vrot.slane %v5707_v48, %v5713_v50 }
 0x121   :  { %2602 = vmatprep.subr.bf16.mxu0 %v5076_v55  ;;  %2684 = vmatprep.subr.bf16.mxu1 %v5079_v56 }
 0x124   :  { %2603 = vmatpush1.bf16.msra.mxu0 %v5074_v57  ;;  %2685 = vmatpush1.bf16.msra.mxu1 %v5077_v58 }
 0x125   :  { %2604 = vmatprep.subr.bf16.mxu0 %v5082_v59  ;;  %2686 = vmatprep.subr.bf16.mxu1 %v5085_v60 }
 0x128   :  { %2605 = vmatpush1.bf16.msra.mxu0 %v5080_v61  ;;  %2687 = vmatpush1.bf16.msra.mxu1 %v5083_v62 }
 0x129   :  { %2606 = vmatprep.subr.bf16.mxu0 %v5088_v63  ;;  %2688 = vmatprep.subr.bf16.mxu1 %v5091_v0 }
 0x12c   :  { %2607 = vmatpush1.bf16.msra.mxu0 %v5086_v1  ;;  %2689 = vmatpush1.bf16.msra.mxu1 %v5089_v2 }
 0x12d   :  { %2608 = vmatprep.subr.bf16.mxu0 %v5094_v3  ;;  %2690 = vmatprep.subr.bf16.mxu1 %v5097_v4 }
 0x130   :  { %2609 = vmatpush1.bf16.msra.mxu0 %v5092_v5  ;;  %2691 = vmatpush1.bf16.msra.mxu1 %v5095_v6  ;;  %v5152_v5 = vld [vmem:[#allocation5 + $0x200] ss:$16 sps:$4 sm:$0xff]   ;;  %v5155_v6 = vld [vmem:[#allocation5 + $0x208] ss:$16 sps:$4 sm:$0xff]  }
 0x131   :  { %2610 = vmatprep.subr.bf16.mxu0 %v5100_v7  ;;  %2692 = vmatprep.subr.bf16.mxu1 %v5103_v8  ;;  %v5160_v8 = vld [vmem:[#allocation5 + $0x224] ss:$16 sps:$4 sm:$0xff]  }
 0x134   :  { %2611 = vmatpush1.bf16.msra.mxu0 %v5098_v9  ;;  %2693 = vmatpush1.bf16.msra.mxu1 %v5101_v10  ;;  %v5163_v9 = vld [vmem:[#allocation5 + $0x22c] ss:$16 sps:$4 sm:$0xff]  }
 0x135   :  { %2612 = vmatprep.subr.bf16.mxu0 %v5106_v12  ;;  %2694 = vmatprep.subr.bf16.mxu1 %v5109_v13  ;;  %v5158_v12 = vld [vmem:[#allocation5 + $0x220] ss:$16 sps:$4 sm:$0xff]   ;;  %v5161_v13 = vld [vmem:[#allocation5 + $0x228] ss:$16 sps:$4 sm:$0xff]  }
 0x138   :  { %2613 = vmatpush1.bf16.msra.mxu0 %v5104_v14  ;;  %2695 = vmatpush1.bf16.msra.mxu1 %v5107_v15  ;;  %v5166_v14 = vld [vmem:[#allocation5 + $0x244] ss:$16 sps:$4 sm:$0xff]   ;;  %v5169_v15 = vld [vmem:[#allocation5 + $0x24c] ss:$16 sps:$4 sm:$0xff]  }
 0x139   :  { %2614 = vmatprep.subr.bf16.mxu0 %v5112_v16  ;;  %2696 = vmatprep.subr.bf16.mxu1 %v5115_v17  ;;  %v5164_v16 = vld [vmem:[#allocation5 + $0x240] ss:$16 sps:$4 sm:$0xff]   ;;  %v5167_v17 = vld [vmem:[#allocation5 + $0x248] ss:$16 sps:$4 sm:$0xff]  }
 0x13c   :  { %2615 = vmatpush1.bf16.msra.mxu0 %v5110_v18  ;;  %2697 = vmatpush1.bf16.msra.mxu1 %v5113_v19  ;;  %v5172_v18 = vld [vmem:[#allocation5 + $0x264] ss:$16 sps:$4 sm:$0xff]   ;;  %v5175_v19 = vld [vmem:[#allocation5 + $0x26c] ss:$16 sps:$4 sm:$0xff]  }
 0x13d   :  { %2616 = vmatprep.subr.bf16.mxu0 %v5118_v20  ;;  %2698 = vmatprep.subr.bf16.mxu1 %v5121_v21  ;;  %v5170_v20 = vld [vmem:[#allocation5 + $0x260] ss:$16 sps:$4 sm:$0xff]   ;;  %v5173_v21 = vld [vmem:[#allocation5 + $0x268] ss:$16 sps:$4 sm:$0xff]  }
 0x140   :  { %2617 = vmatpush1.bf16.msra.mxu0 %v5116_v22  ;;  %2699 = vmatpush1.bf16.msra.mxu1 %v5119_v11  ;;  %v5178_v22 = vld [vmem:[#allocation5 + $0x284] ss:$16 sps:$4 sm:$0xff]   ;;  %v5181_v11 = vld [vmem:[#allocation5 + $0x28c] ss:$16 sps:$4 sm:$0xff]  }
 0x141   :  { %2618 = vmatprep.subr.bf16.mxu0 %v5124_v23  ;;  %2700 = vmatprep.subr.bf16.mxu1 %v5127_v24  ;;  %v5176_v23 = vld [vmem:[#allocation5 + $0x280] ss:$16 sps:$4 sm:$0xff]   ;;  %v5179_v24 = vld [vmem:[#allocation5 + $0x288] ss:$16 sps:$4 sm:$0xff]  }
 0x144   :  { %2619 = vmatpush1.bf16.msra.mxu0 %v5122_v25  ;;  %2701 = vmatpush1.bf16.msra.mxu1 %v5125_v26  ;;  %v5184_v25 = vld [vmem:[#allocation5 + $0x2a4] ss:$16 sps:$4 sm:$0xff]   ;;  %v5187_v26 = vld [vmem:[#allocation5 + $0x2ac] ss:$16 sps:$4 sm:$0xff]  }
 0x145   :  { %2620 = vmatprep.subr.bf16.mxu0 %v5130_v27  ;;  %2702 = vmatprep.subr.bf16.mxu1 %v5133_v28  ;;  %v5182_v27 = vld [vmem:[#allocation5 + $0x2a0] ss:$16 sps:$4 sm:$0xff]   ;;  %v5185_v28 = vld [vmem:[#allocation5 + $0x2a8] ss:$16 sps:$4 sm:$0xff]  }
 0x148   :  { %2621 = vmatpush1.bf16.msra.mxu0 %v5128_v29  ;;  %2703 = vmatpush1.bf16.msra.mxu1 %v5131_v30  ;;  %v5190_v29 = vld [vmem:[#allocation5 + $0x2c4] ss:$16 sps:$4 sm:$0xff]   ;;  %v5193_v30 = vld [vmem:[#allocation5 + $0x2cc] ss:$16 sps:$4 sm:$0xff]  }
 0x149   :  { %2622 = vmatprep.subr.bf16.mxu0 %v5136_v31  ;;  %2704 = vmatprep.subr.bf16.mxu1 %v5139_v32  ;;  %v5188_v31 = vld [vmem:[#allocation5 + $0x2c0] ss:$16 sps:$4 sm:$0xff]   ;;  %v5191_v32 = vld [vmem:[#allocation5 + $0x2c8] ss:$16 sps:$4 sm:$0xff]  }
 0x14c   :  { %2623 = vmatpush1.bf16.msra.mxu0 %v5134_v33  ;;  %2705 = vmatpush1.bf16.msra.mxu1 %v5137_v34  ;;  %v5196_v33 = vld [vmem:[#allocation5 + $0x2e4] ss:$16 sps:$4 sm:$0xff]   ;;  %v5199_v34 = vld [vmem:[#allocation5 + $0x2ec] ss:$16 sps:$4 sm:$0xff]  }
 0x14d   :  { %2624 = vmatprep.subr.bf16.mxu0 %v5142_v35  ;;  %2706 = vmatprep.subr.bf16.mxu1 %v5145_v36  ;;  %v5194_v35 = vld [vmem:[#allocation5 + $0x2e0] ss:$16 sps:$4 sm:$0xff]   ;;  %v5197_v36 = vld [vmem:[#allocation5 + $0x2e8] ss:$16 sps:$4 sm:$0xff]  }
 0x150   :  { %2625 = vmatpush1.bf16.msra.mxu0 %v5140_v37  ;;  %2707 = vmatpush1.bf16.msra.mxu1 %v5143_v38  ;;  %v5202_v37 = vld [vmem:[#allocation5 + $0x304] ss:$16 sps:$4 sm:$0xff]   ;;  %v5205_v38 = vld [vmem:[#allocation5 + $0x30c] ss:$16 sps:$4 sm:$0xff]  }
 0x151   :  { %2626 = vmatprep.subr.bf16.mxu0 %v5148_v39  ;;  %2708 = vmatprep.subr.bf16.mxu1 %v5151_v40  ;;  %v5200_v39 = vld [vmem:[#allocation5 + $0x300] ss:$16 sps:$4 sm:$0xff]   ;;  %v5203_v40 = vld [vmem:[#allocation5 + $0x308] ss:$16 sps:$4 sm:$0xff]  }
 0x154   :  { %2627 = vmatpush1.bf16.msra.mxu0 %v5146_v41  ;;  %2709 = vmatpush1.bf16.msra.mxu1 %v5149_v42  ;;  %v5208_v41 = vld [vmem:[#allocation5 + $0x324] ss:$16 sps:$4 sm:$0xff]   ;;  %v5211_v42 = vld [vmem:[#allocation5 + $0x32c] ss:$16 sps:$4 sm:$0xff]  }
 0x155   :  { %2637 = vmatprep.subr.bf16.mxu0 %v5154_v43  ;;  %2719 = vmatprep.subr.bf16.mxu1 %v5157_v44  ;;  %v5206_v43 = vld [vmem:[#allocation5 + $0x320] ss:$16 sps:$4 sm:$0xff]   ;;  %v5209_v44 = vld [vmem:[#allocation5 + $0x328] ss:$16 sps:$4 sm:$0xff]  }
 0x1ea   :  { %v1627_v54 = vpop.f32.mrb[0].mxu0  ;;  %v5721_v55 = vpop.f32.mrb[0].mxu1 }
 0x1eb   :  { %v4654_v56 = vadd.f32 %v1627_v54, %v308_v51  ;;  %v1629_v57 = vpop.f32.mrb[1].mxu0  ;;  %v1793_v58 = vpop.f32.mrb[1].mxu1  ;;  %v5217_v51 = vld [vmem:[#allocation5 + $0x34c] ss:$16 sps:$4 sm:$0xff]   ;;  %v5220_v54 = vld [vmem:[#allocation5 + $0x364] ss:$16 sps:$4 sm:$0xff]  }
 0x1ec   :  { %v4655_v59 = vadd.f32 %v1629_v57, %v312_v52  ;;  %v4657_v60 = vadd.f32 %v1793_v58, %v320_v53  ;;  %v1631_v61 = vpop.f32.mrb[2].mxu0  ;;  %v1795_v62 = vpop.f32.mrb[2].mxu1  ;;  %v5212_v52 = vld [vmem:[#allocation5 + $0x340] ss:$16 sps:$4 sm:$0xff]   ;;  %v5215_v53 = vld [vmem:[#allocation5 + $0x348] ss:$16 sps:$4 sm:$0xff]  }
 0x1ed   :  { %v1798_v63 = vmax.f32 %v4654_v56, 0.0  ;;  %v1632_v0 = vpop.f32.mrb[3].mxu0  ;;  %v1796_v1 = vpop.f32.mrb[3].mxu1  ;;  %v5223_v56 = vld [vmem:[#allocation5 + $0x36c] ss:$16 sps:$4 sm:$0xff]  }
 0x1ee   :  { %v1799_v2 = vmax.f32 %v4655_v59, 0.0  ;;  %v1801_v3 = vmax.f32 %v4657_v60, 0.0  ;;  %v5218_v57 = vld [vmem:[#allocation5 + $0x360] ss:$16 sps:$4 sm:$0xff]   ;;  %v5221_v58 = vld [vmem:[#allocation5 + $0x368] ss:$16 sps:$4 sm:$0xff]  }
 0x1ef   :  { %v1802_v7 = vpack.c.bf16 %v1798_v63, %v1798_v63  ;;  %v5226_v59 = vld [vmem:[#allocation5 + $0x384] ss:$16 sps:$4 sm:$0xff]   ;;  %v5229_v60 = vld [vmem:[#allocation5 + $0x38c] ss:$16 sps:$4 sm:$0xff]   ;;  %v5224_v61 = vld [vmem:[#allocation5 + $0x380] ss:$16 sps:$4 sm:$0xff]  }
 0x1f0   :  { %v1803_v4 = vpack.c.bf16 %v1799_v2, %v1799_v2  ;;  %v1805_v10 = vpack.c.bf16 %v1801_v3, %v1801_v3  ;;  %v5227_v62 = vld [vmem:[#allocation5 + $0x388] ss:$16 sps:$4 sm:$0xff]   ;;  %v5724_v63 = vsub.s32 2, %v5699_v46  ;;  %v5232_v0 = vld [vmem:[#allocation5 + $0x3a4] ss:$16 sps:$4 sm:$0xff]  }
 0x1f1   :  { %v5235_v1 = vld [vmem:[#allocation5 + $0x3ac] ss:$16 sps:$4 sm:$0xff]   ;;  %v5230_v2 = vld [vmem:[#allocation5 + $0x3a0] ss:$16 sps:$4 sm:$0xff]   ;;  %v5233_v3 = vld [vmem:[#allocation5 + $0x3a8] ss:$16 sps:$4 sm:$0xff]  }
 0x1f2   :  { %2628 = vmatprep.mubr.bf16.mxu0 %v1803_v4  ;;  %2710 = vmatprep.mubr.bf16.mxu1 %v1803_v4  ;;  %v316_v4 = vrot.slane %v5707_v48, %v5724_v63  ;;  %v5239_v46 = vld [vmem:[#allocation5 + $0x3c8] ss:$16 sps:$4 sm:$0xff]   ;;  %v5250_v48 = vld [vmem:[#allocation7 + $0x4] ss:$16 sps:$4 sm:$0xff]  }
 0x1f3   :  { %2629 = vmatmul.mubr.bf16.vlgmr.msra.gmra.mrb[4].mxu0 %v1802_v7  ;;  %2711 = vmatmul.mubr.bf16.vlgmr.msra.gmra.mrb[4].mxu1 %v1802_v7  ;;  %v5236_v7 = vld [vmem:[#allocation5 + $0x3c0] ss:$16 sps:$4 sm:$0xff]  }
 0x1f4   :  { %2638 = vmatpush1.bf16.msra.mxu0 %v5152_v5  ;;  %2720 = vmatpush1.bf16.msra.mxu1 %v5155_v6  ;;  %v5238_v5 = vld [vmem:[#allocation5 + $0x3c4] ss:$16 sps:$4 sm:$0xff]   ;;  %v5241_v6 = vld [vmem:[#allocation5 + $0x3cc] ss:$16 sps:$4 sm:$0xff]  }
 0x1f5   :  { %2669 = vmatprep.mubr.bf16.mxu0 %v1805_v10  ;;  %2751 = vmatprep.mubr.bf16.mxu1 %v1805_v10  ;;  %v5247_v10 = vld [vmem:[#allocation5 + $0x3ec] ss:$16 sps:$4 sm:$0xff]  }
 0x1f6   :  { %2639 = vmatprep.subr.bf16.mxu0 %v5160_v8  ;;  %2721 = vmatprep.subr.bf16.mxu1 %v5163_v9  ;;  %v4656_v8 = vadd.f32 %v5721_v55, %v316_v4  ;;  %v5244_v9 = vld [vmem:[#allocation5 + $0x3e4] ss:$16 sps:$4 sm:$0xff]  }
 0x1f7   :  { %v5256_v55 = vld [vmem:[#allocation7 + $0x24] ss:$16 sps:$4 sm:$0xff]  }
 0x1f8   :  { %2640 = vmatpush1.bf16.msra.mxu0 %v5158_v12  ;;  %2722 = vmatpush1.bf16.msra.mxu1 %v5161_v13  ;;  %v5242_v12 = vld [vmem:[#allocation5 + $0x3e0] ss:$16 sps:$4 sm:$0xff]   ;;  %v5245_v13 = vld [vmem:[#allocation5 + $0x3e8] ss:$16 sps:$4 sm:$0xff]   ;;  %v5322_v4 = vld [vmem:[#allocation7 + $0x184] ss:$16 sps:$4 sm:$0xff]  }
 0x1f9   :  { %2641 = vmatprep.subr.bf16.mxu0 %v5166_v14  ;;  %2723 = vmatprep.subr.bf16.mxu1 %v5169_v15  ;;  %v1800_v14 = vmax.f32 %v4656_v8, 0.0  ;;  %v5253_v15 = vld [vmem:[#allocation7 + $0xc] ss:$16 sps:$4 sm:$0xff]  }
 0x1fa   :  { %v5331_v8 = vld [vmem:[#allocation7 + $0x1ac] ss:$16 sps:$4 sm:$0xff]  }
 0x1fc   :  { %2642 = vmatpush1.bf16.msra.mxu0 %v5164_v16  ;;  %2724 = vmatpush1.bf16.msra.mxu1 %v5167_v17  ;;  %v5248_v16 = vld [vmem:[#allocation7] ss:$16 sps:$4 sm:$0xff]   ;;  %v5251_v17 = vld [vmem:[#allocation7 + $0x8] ss:$16 sps:$4 sm:$0xff]  }
 0x1fd   :  { %2643 = vmatprep.subr.bf16.mxu0 %v5172_v18  ;;  %2725 = vmatprep.subr.bf16.mxu1 %v5175_v19  ;;  %v1804_v18 = vpack.c.bf16 %v1800_v14, %v1800_v14  ;;  %v5259_v19 = vld [vmem:[#allocation7 + $0x2c] ss:$16 sps:$4 sm:$0xff]   ;;  %v5332_v14 = vld [vmem:[#allocation7 + $0x1c0] ss:$16 sps:$4 sm:$0xff]  }
 0x200   :  { %2644 = vmatpush1.bf16.msra.mxu0 %v5170_v20  ;;  %2726 = vmatpush1.bf16.msra.mxu1 %v5173_v21  ;;  %v5254_v20 = vld [vmem:[#allocation7 + $0x20] ss:$16 sps:$4 sm:$0xff]   ;;  %v5257_v21 = vld [vmem:[#allocation7 + $0x28] ss:$16 sps:$4 sm:$0xff]  }
 0x201   :  { %2645 = vmatprep.subr.bf16.mxu0 %v5178_v22  ;;  %2727 = vmatprep.subr.bf16.mxu1 %v5181_v11  ;;  %v5262_v22 = vld [vmem:[#allocation7 + $0x44] ss:$16 sps:$4 sm:$0xff]   ;;  %v5265_v11 = vld [vmem:[#allocation7 + $0x4c] ss:$16 sps:$4 sm:$0xff]  }
 0x204   :  { %2646 = vmatpush1.bf16.msra.mxu0 %v5176_v23  ;;  %2728 = vmatpush1.bf16.msra.mxu1 %v5179_v24  ;;  %v5260_v23 = vld [vmem:[#allocation7 + $0x40] ss:$16 sps:$4 sm:$0xff]   ;;  %v5263_v24 = vld [vmem:[#allocation7 + $0x48] ss:$16 sps:$4 sm:$0xff]  }
 0x205   :  { %2647 = vmatprep.subr.bf16.mxu0 %v5184_v25  ;;  %2729 = vmatprep.subr.bf16.mxu1 %v5187_v26  ;;  %v5268_v25 = vld [vmem:[#allocation7 + $0x64] ss:$16 sps:$4 sm:$0xff]   ;;  %v5271_v26 = vld [vmem:[#allocation7 + $0x6c] ss:$16 sps:$4 sm:$0xff]  }
 0x208   :  { %2648 = vmatpush1.bf16.msra.mxu0 %v5182_v27  ;;  %2730 = vmatpush1.bf16.msra.mxu1 %v5185_v28  ;;  %v5266_v27 = vld [vmem:[#allocation7 + $0x60] ss:$16 sps:$4 sm:$0xff]   ;;  %v5269_v28 = vld [vmem:[#allocation7 + $0x68] ss:$16 sps:$4 sm:$0xff]  }
 0x209   :  { %2649 = vmatprep.subr.bf16.mxu0 %v5190_v29  ;;  %2731 = vmatprep.subr.bf16.mxu1 %v5193_v30  ;;  %v5274_v29 = vld [vmem:[#allocation7 + $0x84] ss:$16 sps:$4 sm:$0xff]   ;;  %v5277_v30 = vld [vmem:[#allocation7 + $0x8c] ss:$16 sps:$4 sm:$0xff]  }
 0x20c   :  { %2650 = vmatpush1.bf16.msra.mxu0 %v5188_v31  ;;  %2732 = vmatpush1.bf16.msra.mxu1 %v5191_v32  ;;  %v5272_v31 = vld [vmem:[#allocation7 + $0x80] ss:$16 sps:$4 sm:$0xff]   ;;  %v5275_v32 = vld [vmem:[#allocation7 + $0x88] ss:$16 sps:$4 sm:$0xff]  }
 0x20d   :  { %2651 = vmatprep.subr.bf16.mxu0 %v5196_v33  ;;  %2733 = vmatprep.subr.bf16.mxu1 %v5199_v34  ;;  %v5280_v33 = vld [vmem:[#allocation7 + $0xa4] ss:$16 sps:$4 sm:$0xff]   ;;  %v5283_v34 = vld [vmem:[#allocation7 + $0xac] ss:$16 sps:$4 sm:$0xff]  }
 0x210   :  { %2652 = vmatpush1.bf16.msra.mxu0 %v5194_v35  ;;  %2734 = vmatpush1.bf16.msra.mxu1 %v5197_v36  ;;  %v5278_v35 = vld [vmem:[#allocation7 + $0xa0] ss:$16 sps:$4 sm:$0xff]   ;;  %v5281_v36 = vld [vmem:[#allocation7 + $0xa8] ss:$16 sps:$4 sm:$0xff]  }
 0x211   :  { %2653 = vmatprep.subr.bf16.mxu0 %v5202_v37  ;;  %2735 = vmatprep.subr.bf16.mxu1 %v5205_v38  ;;  %v5286_v37 = vld [vmem:[#allocation7 + $0xc4] ss:$16 sps:$4 sm:$0xff]   ;;  %v5289_v38 = vld [vmem:[#allocation7 + $0xcc] ss:$16 sps:$4 sm:$0xff]  }
 0x214   :  { %2654 = vmatpush1.bf16.msra.mxu0 %v5200_v39  ;;  %2736 = vmatpush1.bf16.msra.mxu1 %v5203_v40  ;;  %v5284_v39 = vld [vmem:[#allocation7 + $0xc0] ss:$16 sps:$4 sm:$0xff]   ;;  %v5287_v40 = vld [vmem:[#allocation7 + $0xc8] ss:$16 sps:$4 sm:$0xff]  }
 0x215   :  { %2655 = vmatprep.subr.bf16.mxu0 %v5208_v41  ;;  %2737 = vmatprep.subr.bf16.mxu1 %v5211_v42  ;;  %v5292_v41 = vld [vmem:[#allocation7 + $0xe4] ss:$16 sps:$4 sm:$0xff]   ;;  %v5295_v42 = vld [vmem:[#allocation7 + $0xec] ss:$16 sps:$4 sm:$0xff]  }
 0x218   :  { %2656 = vmatpush1.bf16.msra.mxu0 %v5206_v43  ;;  %2738 = vmatpush1.bf16.msra.mxu1 %v5209_v44  ;;  %v5290_v43 = vld [vmem:[#allocation7 + $0xe0] ss:$16 sps:$4 sm:$0xff]   ;;  %v5293_v44 = vld [vmem:[#allocation7 + $0xe8] ss:$16 sps:$4 sm:$0xff]  }
 0x219   :  { %2657 = vmatprep.subr.bf16.mxu0 %v5214_v45  ;;  %2739 = vmatprep.subr.bf16.mxu1 %v5217_v51  ;;  %v5298_v45 = vld [vmem:[#allocation7 + $0x104] ss:$16 sps:$4 sm:$0xff]   ;;  %v5301_v51 = vld [vmem:[#allocation7 + $0x10c] ss:$16 sps:$4 sm:$0xff]  }
 0x21c   :  { %2658 = vmatpush1.bf16.msra.mxu0 %v5212_v52  ;;  %2740 = vmatpush1.bf16.msra.mxu1 %v5215_v53  ;;  %v5296_v52 = vld [vmem:[#allocation7 + $0x100] ss:$16 sps:$4 sm:$0xff]   ;;  %v5299_v53 = vld [vmem:[#allocation7 + $0x108] ss:$16 sps:$4 sm:$0xff]  }
 0x21d   :  { %2659 = vmatprep.subr.bf16.mxu0 %v5220_v54  ;;  %2741 = vmatprep.subr.bf16.mxu1 %v5223_v56  ;;  %v5304_v54 = vld [vmem:[#allocation7 + $0x124] ss:$16 sps:$4 sm:$0xff]   ;;  %v5307_v56 = vld [vmem:[#allocation7 + $0x12c] ss:$16 sps:$4 sm:$0xff]  }
 0x220   :  { %2660 = vmatpush1.bf16.msra.mxu0 %v5218_v57  ;;  %2742 = vmatpush1.bf16.msra.mxu1 %v5221_v58  ;;  %v5302_v57 = vld [vmem:[#allocation7 + $0x120] ss:$16 sps:$4 sm:$0xff]   ;;  %v5305_v58 = vld [vmem:[#allocation7 + $0x128] ss:$16 sps:$4 sm:$0xff]  }
 0x221   :  { %2661 = vmatprep.subr.bf16.mxu0 %v5226_v59  ;;  %2743 = vmatprep.subr.bf16.mxu1 %v5229_v60  ;;  %v5310_v59 = vld [vmem:[#allocation7 + $0x144] ss:$16 sps:$4 sm:$0xff]   ;;  %v5313_v60 = vld [vmem:[#allocation7 + $0x14c] ss:$16 sps:$4 sm:$0xff]  }
 0x224   :  { %2662 = vmatpush1.bf16.msra.mxu0 %v5224_v61  ;;  %2744 = vmatpush1.bf16.msra.mxu1 %v5227_v62  ;;  %v5308_v61 = vld [vmem:[#allocation7 + $0x140] ss:$16 sps:$4 sm:$0xff]   ;;  %v5311_v62 = vld [vmem:[#allocation7 + $0x148] ss:$16 sps:$4 sm:$0xff]  }
 0x225   :  { %2663 = vmatprep.subr.bf16.mxu0 %v5232_v0  ;;  %2745 = vmatprep.subr.bf16.mxu1 %v5235_v1  ;;  %v5316_v0 = vld [vmem:[#allocation7 + $0x164] ss:$16 sps:$4 sm:$0xff]   ;;  %v5319_v1 = vld [vmem:[#allocation7 + $0x16c] ss:$16 sps:$4 sm:$0xff]  }
 0x228   :  { %2664 = vmatpush1.bf16.msra.mxu0 %v5230_v2  ;;  %2746 = vmatpush1.bf16.msra.mxu1 %v5233_v3  ;;  %v5314_v2 = vld [vmem:[#allocation7 + $0x160] ss:$16 sps:$4 sm:$0xff]   ;;  %v5317_v3 = vld [vmem:[#allocation7 + $0x168] ss:$16 sps:$4 sm:$0xff]  }
 0x229   :  { %2665 = vmatprep.subr.bf16.mxu0 %v5238_v5  ;;  %2747 = vmatprep.subr.bf16.mxu1 %v5241_v6  ;;  %v5325_v5 = vld [vmem:[#allocation7 + $0x18c] ss:$16 sps:$4 sm:$0xff]   ;;  %v5320_v6 = vld [vmem:[#allocation7 + $0x180] ss:$16 sps:$4 sm:$0xff]  }
 0x22c   :  { %2666 = vmatpush1.bf16.msra.mxu0 %v5236_v7  ;;  %2748 = vmatpush1.bf16.msra.mxu1 %v5239_v46  ;;  %v5323_v7 = vld [vmem:[#allocation7 + $0x188] ss:$16 sps:$4 sm:$0xff]   ;;  %v5328_v46 = vld [vmem:[#allocation7 + $0x1a4] ss:$16 sps:$4 sm:$0xff]  }
 0x22d   :  { %2667 = vmatprep.subr.bf16.mxu0 %v5244_v9  ;;  %2749 = vmatprep.subr.bf16.mxu1 %v5247_v10  ;;  %v5326_v9 = vld [vmem:[#allocation7 + $0x1a0] ss:$16 sps:$4 sm:$0xff]   ;;  %v5329_v10 = vld [vmem:[#allocation7 + $0x1a8] ss:$16 sps:$4 sm:$0xff]  }
 0x230   :  { %2668 = vmatpush1.bf16.msra.mxu0 %v5242_v12  ;;  %2750 = vmatpush1.bf16.msra.mxu1 %v5245_v13  ;;  %v5334_v12 = vld [vmem:[#allocation7 + $0x1c4] ss:$16 sps:$4 sm:$0xff]   ;;  %v5337_v13 = vld [vmem:[#allocation7 + $0x1cc] ss:$16 sps:$4 sm:$0xff]  }
 0x231   :  { %3558 = vmatprep.subr.bf16.mxu0 %v5250_v48  ;;  %3640 = vmatprep.subr.bf16.mxu1 %v5253_v15  ;;  %v5335_v48 = vld [vmem:[#allocation7 + $0x1c8] ss:$16 sps:$4 sm:$0xff]   ;;  %v5340_v15 = vld [vmem:[#allocation7 + $0x1e4] ss:$16 sps:$4 sm:$0xff]  }
 0x233   :  { %2670 = vmatmul.mubr.bf16.vlgmr.msra.gmra.mrb[4].mxu0 %v1804_v18  ;;  %2752 = vmatmul.mubr.bf16.vlgmr.msra.gmra.mrb[4].mxu1 %v1804_v18  ;;  %v5341_v18 = vld [vmem:[#allocation7 + $0x1e8] ss:$16 sps:$4 sm:$0xff]  }
 0x234   :  { %3559 = vmatpush1.bf16.msra.mxu0 %v5248_v16  ;;  %3641 = vmatpush1.bf16.msra.mxu1 %v5251_v17  ;;  %v5343_v16 = vld [vmem:[#allocation7 + $0x1ec] ss:$16 sps:$4 sm:$0xff]   ;;  %v5338_v17 = vld [vmem:[#allocation7 + $0x1e0] ss:$16 sps:$4 sm:$0xff]  }
 0x235   :  { %3560 = vmatprep.subr.bf16.mxu0 %v5256_v55  ;;  %3642 = vmatprep.subr.bf16.mxu1 %v5259_v19  ;;  %v5346_v55 = vld [vmem:[#allocation7 + $0x204] ss:$16 sps:$4 sm:$0xff]   ;;  %v5349_v19 = vld [vmem:[#allocation7 + $0x20c] ss:$16 sps:$4 sm:$0xff]  }
 0x238   :  { %3561 = vmatpush1.bf16.msra.mxu0 %v5254_v20  ;;  %3643 = vmatpush1.bf16.msra.mxu1 %v5257_v21  ;;  %v5732_v20 = vld [vmem:[%s5867_s4] sm:$0xf] }
 0x239   :  { %3562 = vmatprep.subr.bf16.mxu0 %v5262_v22  ;;  %3644 = vmatprep.subr.bf16.mxu1 %v5265_v11  ;;  %v1939_v21 = vrot.slane %v5732_v20, %v5702_v47  ;;  %v1943_v22 = vrot.slane %v5732_v20, %v5710_v49  ;;  %v1951_v11 = vrot.slane %v5732_v20, %v5713_v50 }
 0x23c   :  { %3563 = vmatpush1.bf16.msra.mxu0 %v5260_v23  ;;  %3645 = vmatpush1.bf16.msra.mxu1 %v5263_v24 }
 0x23d   :  { %3564 = vmatprep.subr.bf16.mxu0 %v5268_v25  ;;  %3646 = vmatprep.subr.bf16.mxu1 %v5271_v26 }
 0x240   :  { %3565 = vmatpush1.bf16.msra.mxu0 %v5266_v27  ;;  %3647 = vmatpush1.bf16.msra.mxu1 %v5269_v28 }
 0x241   :  { %3566 = vmatprep.subr.bf16.mxu0 %v5274_v29  ;;  %3648 = vmatprep.subr.bf16.mxu1 %v5277_v30 }
 0x244   :  { %3567 = vmatpush1.bf16.msra.mxu0 %v5272_v31  ;;  %3649 = vmatpush1.bf16.msra.mxu1 %v5275_v32 }
 0x245   :  { %3568 = vmatprep.subr.bf16.mxu0 %v5280_v33  ;;  %3650 = vmatprep.subr.bf16.mxu1 %v5283_v34 }
 0x248   :  { %3569 = vmatpush1.bf16.msra.mxu0 %v5278_v35  ;;  %3651 = vmatpush1.bf16.msra.mxu1 %v5281_v36 }
 0x249   :  { %3570 = vmatprep.subr.bf16.mxu0 %v5286_v37  ;;  %3652 = vmatprep.subr.bf16.mxu1 %v5289_v38  ;;  %v5344_v38 = vld [vmem:[#allocation7 + $0x200] ss:$16 sps:$4 sm:$0xff]  }
 0x24c   :  { %3571 = vmatpush1.bf16.msra.mxu0 %v5284_v39  ;;  %3653 = vmatpush1.bf16.msra.mxu1 %v5287_v40  ;;  %v5347_v39 = vld [vmem:[#allocation7 + $0x208] ss:$16 sps:$4 sm:$0xff]  }
 0x24d   :  { %3572 = vmatprep.subr.bf16.mxu0 %v5292_v41  ;;  %3654 = vmatprep.subr.bf16.mxu1 %v5295_v42  ;;  %v5352_v41 = vld [vmem:[#allocation7 + $0x224] ss:$16 sps:$4 sm:$0xff]   ;;  %v5355_v42 = vld [vmem:[#allocation7 + $0x22c] ss:$16 sps:$4 sm:$0xff]  }
 0x250   :  { %3573 = vmatpush1.bf16.msra.mxu0 %v5290_v43  ;;  %3655 = vmatpush1.bf16.msra.mxu1 %v5293_v44  ;;  %v5350_v44 = vld [vmem:[#allocation7 + $0x220] ss:$16 sps:$4 sm:$0xff]  }
 0x251   :  { %3574 = vmatprep.subr.bf16.mxu0 %v5298_v45  ;;  %3656 = vmatprep.subr.bf16.mxu1 %v5301_v51  ;;  %v5353_v45 = vld [vmem:[#allocation7 + $0x228] ss:$16 sps:$4 sm:$0xff]   ;;  %v5358_v51 = vld [vmem:[#allocation7 + $0x244] ss:$16 sps:$4 sm:$0xff]  }
 0x254   :  { %3575 = vmatpush1.bf16.msra.mxu0 %v5296_v52  ;;  %3657 = vmatpush1.bf16.msra.mxu1 %v5299_v53  ;;  %v5361_v52 = vld [vmem:[#allocation7 + $0x24c] ss:$16 sps:$4 sm:$0xff]   ;;  %v5356_v53 = vld [vmem:[#allocation7 + $0x240] ss:$16 sps:$4 sm:$0xff]  }
 0x255   :  { %3576 = vmatprep.subr.bf16.mxu0 %v5304_v54  ;;  %3658 = vmatprep.subr.bf16.mxu1 %v5307_v56  ;;  %v5359_v54 = vld [vmem:[#allocation7 + $0x248] ss:$16 sps:$4 sm:$0xff]   ;;  %v5364_v56 = vld [vmem:[#allocation7 + $0x264] ss:$16 sps:$4 sm:$0xff]  }
 0x258   :  { %3577 = vmatpush1.bf16.msra.mxu0 %v5302_v57  ;;  %3659 = vmatpush1.bf16.msra.mxu1 %v5305_v58  ;;  %v5367_v57 = vld [vmem:[#allocation7 + $0x26c] ss:$16 sps:$4 sm:$0xff]   ;;  %v5362_v58 = vld [vmem:[#allocation7 + $0x260] ss:$16 sps:$4 sm:$0xff]  }
 0x259   :  { %3578 = vmatprep.subr.bf16.mxu0 %v5310_v59  ;;  %3660 = vmatprep.subr.bf16.mxu1 %v5313_v60  ;;  %v5365_v59 = vld [vmem:[#allocation7 + $0x268] ss:$16 sps:$4 sm:$0xff]   ;;  %v5370_v60 = vld [vmem:[#allocation7 + $0x284] ss:$16 sps:$4 sm:$0xff]  }
 0x25c   :  { %3579 = vmatpush1.bf16.msra.mxu0 %v5308_v61  ;;  %3661 = vmatpush1.bf16.msra.mxu1 %v5311_v62  ;;  %v5373_v61 = vld [vmem:[#allocation7 + $0x28c] ss:$16 sps:$4 sm:$0xff]   ;;  %v5368_v62 = vld [vmem:[#allocation7 + $0x280] ss:$16 sps:$4 sm:$0xff]  }
 0x25d   :  { %3580 = vmatprep.subr.bf16.mxu0 %v5316_v0  ;;  %3662 = vmatprep.subr.bf16.mxu1 %v5319_v1  ;;  %v5371_v0 = vld [vmem:[#allocation7 + $0x288] ss:$16 sps:$4 sm:$0xff]   ;;  %v5376_v1 = vld [vmem:[#allocation7 + $0x2a4] ss:$16 sps:$4 sm:$0xff]  }
 0x260   :  { %3581 = vmatpush1.bf16.msra.mxu0 %v5314_v2  ;;  %3663 = vmatpush1.bf16.msra.mxu1 %v5317_v3  ;;  %v5379_v2 = vld [vmem:[#allocation7 + $0x2ac] ss:$16 sps:$4 sm:$0xff]   ;;  %v5374_v3 = vld [vmem:[#allocation7 + $0x2a0] ss:$16 sps:$4 sm:$0xff]  }
 0x261   :  { %3582 = vmatprep.subr.bf16.mxu0 %v5322_v4  ;;  %3664 = vmatprep.subr.bf16.mxu1 %v5325_v5  ;;  %v5377_v4 = vld [vmem:[#allocation7 + $0x2a8] ss:$16 sps:$4 sm:$0xff]   ;;  %v5382_v5 = vld [vmem:[#allocation7 + $0x2c4] ss:$16 sps:$4 sm:$0xff]  }
 0x264   :  { %3583 = vmatpush1.bf16.msra.mxu0 %v5320_v6  ;;  %3665 = vmatpush1.bf16.msra.mxu1 %v5323_v7  ;;  %v5385_v6 = vld [vmem:[#allocation7 + $0x2cc] ss:$16 sps:$4 sm:$0xff]   ;;  %v5380_v7 = vld [vmem:[#allocation7 + $0x2c0] ss:$16 sps:$4 sm:$0xff]  }
 0x265   :  { %3584 = vmatprep.subr.bf16.mxu0 %v5328_v46  ;;  %3666 = vmatprep.subr.bf16.mxu1 %v5331_v8  ;;  %v5383_v46 = vld [vmem:[#allocation7 + $0x2c8] ss:$16 sps:$4 sm:$0xff]   ;;  %v5388_v8 = vld [vmem:[#allocation7 + $0x2e4] ss:$16 sps:$4 sm:$0xff]  }
 0x268   :  { %3585 = vmatpush1.bf16.msra.mxu0 %v5326_v9  ;;  %3667 = vmatpush1.bf16.msra.mxu1 %v5329_v10  ;;  %v5391_v9 = vld [vmem:[#allocation7 + $0x2ec] ss:$16 sps:$4 sm:$0xff]   ;;  %v5386_v10 = vld [vmem:[#allocation7 + $0x2e0] ss:$16 sps:$4 sm:$0xff]  }
 0x269   :  { %3586 = vmatprep.subr.bf16.mxu0 %v5334_v12  ;;  %3668 = vmatprep.subr.bf16.mxu1 %v5337_v13  ;;  %v5389_v12 = vld [vmem:[#allocation7 + $0x2e8] ss:$16 sps:$4 sm:$0xff]   ;;  %v5394_v13 = vld [vmem:[#allocation7 + $0x304] ss:$16 sps:$4 sm:$0xff]  }
 0x26c   :  { %3587 = vmatpush1.bf16.msra.mxu0 %v5332_v14  ;;  %3669 = vmatpush1.bf16.msra.mxu1 %v5335_v48  ;;  %v5397_v14 = vld [vmem:[#allocation7 + $0x30c] ss:$16 sps:$4 sm:$0xff]   ;;  %v5392_v48 = vld [vmem:[#allocation7 + $0x300] ss:$16 sps:$4 sm:$0xff]  }
 0x26d   :  { %3588 = vmatprep.subr.bf16.mxu0 %v5340_v15  ;;  %3670 = vmatprep.subr.bf16.mxu1 %v5343_v16  ;;  %v5395_v15 = vld [vmem:[#allocation7 + $0x308] ss:$16 sps:$4 sm:$0xff]   ;;  %v5400_v16 = vld [vmem:[#allocation7 + $0x324] ss:$16 sps:$4 sm:$0xff]  }
 0x270   :  { %3589 = vmatpush1.bf16.msra.mxu0 %v5338_v17  ;;  %3671 = vmatpush1.bf16.msra.mxu1 %v5341_v18  ;;  %v5403_v17 = vld [vmem:[#allocation7 + $0x32c] ss:$16 sps:$4 sm:$0xff]   ;;  %v5398_v18 = vld [vmem:[#allocation7 + $0x320] ss:$16 sps:$4 sm:$0xff]  }
 0x271   :  { %3599 = vmatprep.subr.bf16.mxu0 %v5346_v55  ;;  %3681 = vmatprep.subr.bf16.mxu1 %v5349_v19  ;;  %v5401_v55 = vld [vmem:[#allocation7 + $0x328] ss:$16 sps:$4 sm:$0xff]   ;;  %v5406_v19 = vld [vmem:[#allocation7 + $0x344] ss:$16 sps:$4 sm:$0xff]  }
 0x306   :  { %v2671_v23 = vpop.f32.mrb[4].mxu0  ;;  %v5740_v24 = vpop.f32.mrb[4].mxu1 }
 0x307   :  { %v4658_v25 = vadd.f32 %v2671_v23, %v1939_v21  ;;  %v2673_v26 = vpop.f32.mrb[5].mxu0  ;;  %v2755_v27 = vpop.f32.mrb[5].mxu1  ;;  %v5409_v21 = vld [vmem:[#allocation7 + $0x34c] ss:$16 sps:$4 sm:$0xff]   ;;  %v5412_v23 = vld [vmem:[#allocation7 + $0x364] ss:$16 sps:$4 sm:$0xff]  }
 0x308   :  { %v4659_v28 = vadd.f32 %v2673_v26, %v1943_v22  ;;  %v4661_v29 = vadd.f32 %v2755_v27, %v1951_v11  ;;  %v2675_v30 = vpop.f32.mrb[6].mxu0  ;;  %v2757_v31 = vpop.f32.mrb[6].mxu1  ;;  %v5404_v22 = vld [vmem:[#allocation7 + $0x340] ss:$16 sps:$4 sm:$0xff]   ;;  %v5407_v11 = vld [vmem:[#allocation7 + $0x348] ss:$16 sps:$4 sm:$0xff]  }
 0x309   :  { %v2760_v32 = vmax.f32 %v4658_v25, 0.0  ;;  %v2676_v33 = vpop.f32.mrb[7].mxu0  ;;  %v2758_v34 = vpop.f32.mrb[7].mxu1  ;;  %v5415_v25 = vld [vmem:[#allocation7 + $0x36c] ss:$16 sps:$4 sm:$0xff]  }
 0x30a   :  { %v2761_v35 = vmax.f32 %v4659_v28, 0.0  ;;  %v2763_v36 = vmax.f32 %v4661_v29, 0.0  ;;  %v5410_v26 = vld [vmem:[#allocation7 + $0x360] ss:$16 sps:$4 sm:$0xff]   ;;  %v5413_v27 = vld [vmem:[#allocation7 + $0x368] ss:$16 sps:$4 sm:$0xff]  }
 0x30b   :  { %v2764_v40 = vpack.c.bf16 %v2760_v32, %v2760_v32  ;;  %v5418_v28 = vld [vmem:[#allocation7 + $0x384] ss:$16 sps:$4 sm:$0xff]   ;;  %v5421_v29 = vld [vmem:[#allocation7 + $0x38c] ss:$16 sps:$4 sm:$0xff]   ;;  %v5416_v30 = vld [vmem:[#allocation7 + $0x380] ss:$16 sps:$4 sm:$0xff]  }
 0x30c   :  { %v2765_v37 = vpack.c.bf16 %v2761_v35, %v2761_v35  ;;  %v2767_v43 = vpack.c.bf16 %v2763_v36, %v2763_v36  ;;  %v5419_v31 = vld [vmem:[#allocation7 + $0x388] ss:$16 sps:$4 sm:$0xff]   ;;  %v5424_v32 = vld [vmem:[#allocation7 + $0x3a4] ss:$16 sps:$4 sm:$0xff]   ;;  %v5427_v33 = vld [vmem:[#allocation7 + $0x3ac] ss:$16 sps:$4 sm:$0xff]   ;;  %v1947_v36 = vrot.slane %v5732_v20, %v5724_v63 }
 0x30d   :  { %v5422_v34 = vld [vmem:[#allocation7 + $0x3a0] ss:$16 sps:$4 sm:$0xff]   ;;  %v5425_v35 = vld [vmem:[#allocation7 + $0x3a8] ss:$16 sps:$4 sm:$0xff]  }
 0x30e   :  { %3590 = vmatprep.mubr.bf16.mxu0 %v2765_v37  ;;  %3672 = vmatprep.mubr.bf16.mxu1 %v2765_v37  ;;  %v5430_v37 = vld [vmem:[#allocation7 + $0x3c4] ss:$16 sps:$4 sm:$0xff]  }
 0x30f   :  { %3591 = vmatmul.mubr.bf16.vlgmr.msra.gmra.mrb[8].mxu0 %v2764_v40  ;;  %3673 = vmatmul.mubr.bf16.vlgmr.msra.gmra.mrb[8].mxu1 %v2764_v40  ;;  %v5431_v40 = vld [vmem:[#allocation7 + $0x3c8] ss:$16 sps:$4 sm:$0xff]   ;;  %v5440_v20 = vld [vmem:[%s5870_s7 + $0x40] sm:$0xff]  }
 0x310   :  { %3600 = vmatpush1.bf16.msra.mxu0 %v5344_v38  ;;  %3682 = vmatpush1.bf16.msra.mxu1 %v5347_v39  ;;  %v5433_v38 = vld [vmem:[#allocation7 + $0x3cc] ss:$16 sps:$4 sm:$0xff]   ;;  %v5428_v39 = vld [vmem:[#allocation7 + $0x3c0] ss:$16 sps:$4 sm:$0xff]  }
 0x311   :  { %3631 = vmatprep.mubr.bf16.mxu0 %v2767_v43  ;;  %3713 = vmatprep.mubr.bf16.mxu1 %v2767_v43  ;;  %v5439_v43 = vld [vmem:[#allocation7 + $0x3ec] ss:$16 sps:$4 sm:$0xff]  }
 0x312   :  { %3601 = vmatprep.subr.bf16.mxu0 %v5352_v41  ;;  %3683 = vmatprep.subr.bf16.mxu1 %v5355_v42  ;;  %v4660_v41 = vadd.f32 %v5740_v24, %v1947_v36  ;;  %v5436_v42 = vld [vmem:[#allocation7 + $0x3e4] ss:$16 sps:$4 sm:$0xff]  }
 0x313   :  { %v5442_v24 = vld [vmem:[%s5870_s7] sm:$0xff]  }
 0x314   :  { %3602 = vmatpush1.bf16.msra.mxu0 %v5350_v44  ;;  %3684 = vmatpush1.bf16.msra.mxu1 %v5353_v45  ;;  %v5434_v44 = vld [vmem:[#allocation7 + $0x3e0] ss:$16 sps:$4 sm:$0xff]   ;;  %v5437_v45 = vld [vmem:[#allocation7 + $0x3e8] ss:$16 sps:$4 sm:$0xff]  }
 0x315   :  { %3603 = vmatprep.subr.bf16.mxu0 %v5358_v51  ;;  %3685 = vmatprep.subr.bf16.mxu1 %v5361_v52  ;;  %v2762_v51 = vmax.f32 %v4660_v41, 0.0  ;;  %v5441_v52 = vld [vmem:[%s5870_s7 + $0xc0] sm:$0xff]  }
 0x318   :  { %3604 = vmatpush1.bf16.msra.mxu0 %v5356_v53  ;;  %3686 = vmatpush1.bf16.msra.mxu1 %v5359_v54  ;;  %v5443_v53 = vld [vmem:[%s5870_s7 + $0x80] sm:$0xff]   ;;  %v2766_v54 = vpack.c.bf16 %v2762_v51, %v2762_v51 }
 0x319   :  { %3605 = vmatprep.subr.bf16.mxu0 %v5364_v56  ;;  %3687 = vmatprep.subr.bf16.mxu1 %v5367_v57  ;;  %v5444_v56 = vld [vmem:[%s5870_s7 + $0x48] sm:$0xff]  }
 0x31a   :  { %v5445_v57 = vld [vmem:[%s5870_s7 + $0xc8] sm:$0xff]  }
 0x31c   :  { %3606 = vmatpush1.bf16.msra.mxu0 %v5362_v58  ;;  %3688 = vmatpush1.bf16.msra.mxu1 %v5365_v59  ;;  %v5446_v58 = vld [vmem:[%s5870_s7 + $0x8] sm:$0xff]  }
 0x31d   :  { %3607 = vmatprep.subr.bf16.mxu0 %v5370_v60  ;;  %3689 = vmatprep.subr.bf16.mxu1 %v5373_v61  ;;  %v5447_v59 = vld [vmem:[%s5870_s7 + $0x88] sm:$0xff]   ;;  %v5448_v60 = vld [vmem:[%s5870_s7 + $0x50] sm:$0xff]  }
 0x31e   :  { %v5449_v61 = vld [vmem:[%s5870_s7 + $0xd0] sm:$0xff]  }
 0x320   :  { %3608 = vmatpush1.bf16.msra.mxu0 %v5368_v62  ;;  %3690 = vmatpush1.bf16.msra.mxu1 %v5371_v0  ;;  %v5450_v62 = vld [vmem:[%s5870_s7 + $0x10] sm:$0xff]  }
 0x321   :  { %3609 = vmatprep.subr.bf16.mxu0 %v5376_v1  ;;  %3691 = vmatprep.subr.bf16.mxu1 %v5379_v2  ;;  %v5451_v0 = vld [vmem:[%s5870_s7 + $0x90] sm:$0xff]   ;;  %v5452_v1 = vld [vmem:[%s5870_s7 + $0x58] sm:$0xff]  }
 0x322   :  { %v5453_v2 = vld [vmem:[%s5870_s7 + $0xd8] sm:$0xff]  }
 0x324   :  { %3610 = vmatpush1.bf16.msra.mxu0 %v5374_v3  ;;  %3692 = vmatpush1.bf16.msra.mxu1 %v5377_v4  ;;  %v5454_v3 = vld [vmem:[%s5870_s7 + $0x18] sm:$0xff]  }
 0x325   :  { %3611 = vmatprep.subr.bf16.mxu0 %v5382_v5  ;;  %3693 = vmatprep.subr.bf16.mxu1 %v5385_v6  ;;  %v5455_v4 = vld [vmem:[%s5870_s7 + $0x98] sm:$0xff]   ;;  %v5456_v5 = vld [vmem:[%s5870_s7 + $0x60] sm:$0xff]  }
 0x326   :  { %v5457_v6 = vld [vmem:[%s5870_s7 + $0xe0] sm:$0xff]  }
 0x328   :  { %3612 = vmatpush1.bf16.msra.mxu0 %v5380_v7  ;;  %3694 = vmatpush1.bf16.msra.mxu1 %v5383_v46  ;;  %v5458_v7 = vld [vmem:[%s5870_s7 + $0x20] sm:$0xff]  }
 0x329   :  { %3613 = vmatprep.subr.bf16.mxu0 %v5388_v8  ;;  %3695 = vmatprep.subr.bf16.mxu1 %v5391_v9  ;;  %v5459_v46 = vld [vmem:[%s5870_s7 + $0xa0] sm:$0xff]   ;;  %v5460_v8 = vld [vmem:[%s5870_s7 + $0x68] sm:$0xff]  }
 0x32a   :  { %v5461_v9 = vld [vmem:[%s5870_s7 + $0xe8] sm:$0xff]  }
 0x32c   :  { %3614 = vmatpush1.bf16.msra.mxu0 %v5386_v10  ;;  %3696 = vmatpush1.bf16.msra.mxu1 %v5389_v12  ;;  %v5462_v10 = vld [vmem:[%s5870_s7 + $0x28] sm:$0xff]  }
 0x32d   :  { %3615 = vmatprep.subr.bf16.mxu0 %v5394_v13  ;;  %3697 = vmatprep.subr.bf16.mxu1 %v5397_v14  ;;  %v5463_v12 = vld [vmem:[%s5870_s7 + $0xa8] sm:$0xff]   ;;  %v5464_v13 = vld [vmem:[%s5870_s7 + $0x70] sm:$0xff]  }
 0x32e   :  { %v5465_v14 = vld [vmem:[%s5870_s7 + $0xf0] sm:$0xff]  }
 0x330   :  { %3616 = vmatpush1.bf16.msra.mxu0 %v5392_v48  ;;  %3698 = vmatpush1.bf16.msra.mxu1 %v5395_v15  ;;  %v5466_v48 = vld [vmem:[%s5870_s7 + $0x30] sm:$0xff]  }
 0x331   :  { %3617 = vmatprep.subr.bf16.mxu0 %v5400_v16  ;;  %3699 = vmatprep.subr.bf16.mxu1 %v5403_v17  ;;  %v5467_v15 = vld [vmem:[%s5870_s7 + $0xb0] sm:$0xff]   ;;  %v5468_v16 = vld [vmem:[%s5870_s7 + $0x78] sm:$0xff]  }
 0x332   :  { %v5469_v17 = vld [vmem:[%s5870_s7 + $0xf8] sm:$0xff]  }
 0x334   :  { %3618 = vmatpush1.bf16.msra.mxu0 %v5398_v18  ;;  %3700 = vmatpush1.bf16.msra.mxu1 %v5401_v55  ;;  %v5470_v18 = vld [vmem:[%s5870_s7 + $0x38] sm:$0xff]  }
 0x335   :  { %3619 = vmatprep.subr.bf16.mxu0 %v5406_v19  ;;  %3701 = vmatprep.subr.bf16.mxu1 %v5409_v21  ;;  %v5471_v55 = vld [vmem:[%s5870_s7 + $0xb8] sm:$0xff]   ;;  %v2896_v19 = vld [vmem:[%s5869_s6] sm:$0xf] }
 0x336   :  { %v2901_v21 = vrot.slane %v2896_v19, %v5702_v47 }
 0x338   :  { %3620 = vmatpush1.bf16.msra.mxu0 %v5404_v22  ;;  %3702 = vmatpush1.bf16.msra.mxu1 %v5407_v11  ;;  %v2909_v22 = vrot.slane %v2896_v19, %v5724_v63  ;;  %v2905_v11 = vrot.slane %v2896_v19, %v5710_v49 }
 0x339   :  { %3621 = vmatprep.subr.bf16.mxu0 %v5412_v23  ;;  %3703 = vmatprep.subr.bf16.mxu1 %v5415_v25  ;;  %v2913_v23 = vrot.slane %v2896_v19, %v5713_v50 }
 0x33c   :  { %3622 = vmatpush1.bf16.msra.mxu0 %v5410_v26  ;;  %3704 = vmatpush1.bf16.msra.mxu1 %v5413_v27 }
 0x33d   :  { %3623 = vmatprep.subr.bf16.mxu0 %v5418_v28  ;;  %3705 = vmatprep.subr.bf16.mxu1 %v5421_v29 }
 0x340   :  { %3624 = vmatpush1.bf16.msra.mxu0 %v5416_v30  ;;  %3706 = vmatpush1.bf16.msra.mxu1 %v5419_v31 }
 0x341   :  { %3625 = vmatprep.subr.bf16.mxu0 %v5424_v32  ;;  %3707 = vmatprep.subr.bf16.mxu1 %v5427_v33 }
 0x344   :  { %3626 = vmatpush1.bf16.msra.mxu0 %v5422_v34  ;;  %3708 = vmatpush1.bf16.msra.mxu1 %v5425_v35 }
 0x345   :  { %3627 = vmatprep.subr.bf16.mxu0 %v5430_v37  ;;  %3709 = vmatprep.subr.bf16.mxu1 %v5433_v38 }
 0x348   :  { %3628 = vmatpush1.bf16.msra.mxu0 %v5428_v39  ;;  %3710 = vmatpush1.bf16.msra.mxu1 %v5431_v40 }
 0x349   :  { %3629 = vmatprep.subr.bf16.mxu0 %v5436_v42  ;;  %3711 = vmatprep.subr.bf16.mxu1 %v5439_v43  ;;  %v4577_v43 = vld [vmem:[%s5871_s8] ss:$0 sm:$0xff] }
 0x34c   :  { %3630 = vmatpush1.bf16.msra.mxu0 %v5434_v44  ;;  %3712 = vmatpush1.bf16.msra.mxu1 %v5437_v45 }
 0x34d   :  { %4610 = vmatprep.subr.bf16.mxu0 %v5440_v20  ;;  %4632 = vmatprep.subr.bf16.mxu1 %v5441_v52 }
 0x34f   :  { %3632 = vmatmul.mubr.bf16.vlgmr.msra.gmra.mrb[8].mxu0 %v2766_v54  ;;  %3714 = vmatmul.mubr.bf16.vlgmr.msra.gmra.mrb[8].mxu1 %v2766_v54 }
 0x350   :  { %4611 = vmatpush3.bf16.msra.mxu0 %v5442_v24  ;;  %4633 = vmatpush3.bf16.msra.mxu1 %v5443_v53 }
 0x351   :  { %4612 = vmatprep.subr.bf16.mxu0 %v5444_v56  ;;  %4634 = vmatprep.subr.bf16.mxu1 %v5445_v57 }
 0x354   :  { %4613 = vmatpush3.bf16.msra.mxu0 %v5446_v58  ;;  %4635 = vmatpush3.bf16.msra.mxu1 %v5447_v59 }
 0x355   :  { %4614 = vmatprep.subr.bf16.mxu0 %v5448_v60  ;;  %4636 = vmatprep.subr.bf16.mxu1 %v5449_v61 }
 0x358   :  { %4615 = vmatpush3.bf16.msra.mxu0 %v5450_v62  ;;  %4637 = vmatpush3.bf16.msra.mxu1 %v5451_v0 }
 0x359   :  { %4616 = vmatprep.subr.bf16.mxu0 %v5452_v1  ;;  %4638 = vmatprep.subr.bf16.mxu1 %v5453_v2 }
 0x35c   :  { %4617 = vmatpush3.bf16.msra.mxu0 %v5454_v3  ;;  %4639 = vmatpush3.bf16.msra.mxu1 %v5455_v4 }
 0x35d   :  { %4618 = vmatprep.subr.bf16.mxu0 %v5456_v5  ;;  %4640 = vmatprep.subr.bf16.mxu1 %v5457_v6 }
 0x360   :  { %4619 = vmatpush3.bf16.msra.mxu0 %v5458_v7  ;;  %4641 = vmatpush3.bf16.msra.mxu1 %v5459_v46 }
 0x361   :  { %4620 = vmatprep.subr.bf16.mxu0 %v5460_v8  ;;  %4642 = vmatprep.subr.bf16.mxu1 %v5461_v9 }
 0x364   :  { %4621 = vmatpush3.bf16.msra.mxu0 %v5462_v10  ;;  %4643 = vmatpush3.bf16.msra.mxu1 %v5463_v12 }
 0x365   :  { %4622 = vmatprep.subr.bf16.mxu0 %v5464_v13  ;;  %4644 = vmatprep.subr.bf16.mxu1 %v5465_v14 }
 0x368   :  { %4623 = vmatpush3.bf16.msra.mxu0 %v5466_v48  ;;  %4645 = vmatpush3.bf16.msra.mxu1 %v5467_v15 }
 0x369   :  { %4624 = vmatprep.subr.bf16.mxu0 %v5468_v16  ;;  %4646 = vmatprep.subr.bf16.mxu1 %v5469_v17 }
 0x36c   :  { %4625 = vmatpush3.bf16.msra.mxu0 %v5470_v18  ;;  %4647 = vmatpush3.bf16.msra.mxu1 %v5471_v55 }
 0x422   :  { %v3633_v25 = vpop.f32.mrb[8].mxu0  ;;  %v3715_v26 = vpop.f32.mrb[8].mxu1 }
 0x423   :  { %v4662_v27 = vadd.f32 %v3633_v25, %v2901_v21  ;;  %v4664_v28 = vadd.f32 %v3715_v26, %v2909_v22  ;;  %v3635_v29 = vpop.f32.mrb[9].mxu0  ;;  %v3717_v30 = vpop.f32.mrb[9].mxu1 }
 0x424   :  { %v4663_v31 = vadd.f32 %v3635_v29, %v2905_v11  ;;  %v4665_v32 = vadd.f32 %v3717_v30, %v2913_v23  ;;  %v3637_v33 = vpop.f32.mrb[10].mxu0  ;;  %v3719_v34 = vpop.f32.mrb[10].mxu1 }
 0x425   :  { %v3722_v35 = vmax.f32 %v4662_v27, 0.0  ;;  %v3724_v36 = vmax.f32 %v4664_v28, 0.0  ;;  %v3638_v37 = vpop.f32.mrb[11].mxu0  ;;  %v3720_v47 = vpop.f32.mrb[11].mxu1 }
 0x426   :  { %v3723_v38 = vmax.f32 %v4663_v31, 0.0  ;;  %v3725_v63 = vmax.f32 %v4665_v32, 0.0 }
 0x427   :  { %v3726_v40 = vpack.c.bf16 %v3722_v35, %v3722_v35  ;;  %v3728_v50 = vpack.c.bf16 %v3724_v36, %v3724_v36 }
 0x428   :  { %v3727_v39 = vpack.c.bf16 %v3723_v38, %v3723_v38  ;;  %v3729_v49 = vpack.c.bf16 %v3725_v63, %v3725_v63 }
 0x42a   :  { %4025 = vmatprep.mubr.bf16.mxu0 %v3727_v39  ;;  %4065 = vmatprep.mubr.bf16.mxu1 %v3729_v49 }
 0x42b   :  { %4026 = vmatmul.mubr.bf16.vlgmr.msra.gmra.mrb[12].mxu0 %v3726_v40  ;;  %4066 = vmatmul.mubr.bf16.vlgmr.msra.gmra.mrb[12].mxu1 %v3728_v50 }
 0x4fe   :  { %v4626_v41 = vpop.f32.mrb[12].mxu0  ;;  %v4648_v42 = vpop.f32.mrb[12].mxu1 }
 0x4ff   :  { %v4627_v44 = vpop.f32.mrb[13].mxu0  ;;  %v4649_v45 = vpop.f32.mrb[13].mxu1 }
 0x500   :  { %v4628_v51 = vadd.f32 %v4627_v44, %v4626_v41  ;;  %v4650_v20 = vadd.f32 %v4649_v45, %v4648_v42  ;;  %v4629_v52 = vpop.f32.mrb[14].mxu0  ;;  %v4651_v24 = vpop.f32.mrb[14].mxu1 }
 0x501   :  { %v4630_v53 = vpop.f32.mrb[15].mxu0  ;;  %v4652_v54 = vpop.f32.mrb[15].mxu1 }
 0x502   :  { %v4028_v56 = vadd.f32 %v4628_v51, %v4577_v43 }
 0x504   :  { %v4068_v57 = vadd.f32 %v4650_v20, %v4028_v56 }
 0x506   :  { %4073 = vst [vmem:[#allocation8] sm:$0xff] %v4068_v57 }
 0x507   :  { %5549 = shalt.err (!%p5546_p0)
}
 0x508   :  { %s5550_s21 = scalar_lea.hbm %s5872_s9, 128 }
 0x509   :  { %p5551_p1 = scmp.ne.s32.totalorder %s5872_s9, %s5550_s21  ;;  %p5554_p2 = scmp.lt.u32.totalorder %s5550_s21, %s5872_s9 }
 0x50b   :  { %p5556_p3 = pnand %p5554_p2, %p5551_p1 }
 0x50d   :  { %5559 = shalt.err (!%p5556_p3)
}
 0x50e   :  { %4083 = dma.vmem_to_hbm [thread:$0]  %s4081_s1, 128, %s5872_s9, [#allocation4]  }
 0x50f   :  { %5564 = dma.done.wait [#allocation4], 128  }
 0x510   :  { %5565 = vsyncadd [#allocation4], 4294967168 }
 0x511   :  { %4087 = vsyncpa [#allocation3], 1 }
 0x512   :  { %4088 = vsyncpa [#allocation6], 1 }
 0x513   :  { %4089 = vsyncpa [#allocation4], 1 }

</bundles_post_ra>
